<compile_context>
chip_gen: v6e
topology: v6e:2x2x1
jax: 0.10.0
libtpu: 0.0.40
codegen_flags: <defaults>
</compile_context>

<pallas_src>
import jax
import jax.numpy as jnp
from jax.experimental import pallas as pl
from jax.experimental.pallas import tpu as pltpu

# ---- architecture config (stands in for Config.*) ---------------------------
HIDDEN = 32                    # Config.ARCHITECTURE.HIDDEN_SIZE
NUM_HEADS = 4                  # Config.ARCHITECTURE.NUM_ATTENTION_HEADS
HEAD_DIM = HIDDEN // NUM_HEADS
INTERMEDIATE = 64              # Config.ARCHITECTURE.INTERMEDIATE_SIZE
NUM_LAYERS = 2                 # Config.ARCHITECTURE.NUM_HIDDEN_LAYERS
MAX_TEXT_LENGTH = 16           # Config.DATA.MAX_TEXT_LENGTH
LN_EPS = 1e-12

SEQ = 8
BATCH = 2


# TODO(synk): PyTorch nn.GELU() default is the exact erf-based GELU; the tanh
# approximation is used here (and in the reference) to keep the in-kernel math
# on ops guaranteed to lower in Mosaic (max deviation ~1e-3).
def _gelu_tanh(v):
    c = jnp.float32(0.7978845608028654)  # sqrt(2/pi)
    return 0.5 * v * (1.0 + jnp.tanh(c * (v + 0.044715 * v * v * v)))


# ----------------------------- fused layer kernel ----------------------------
def _transformer_layer_kernel(
    x_ref, mask_ref, pe_ref,
    ln1g_ref, ln1b_ref, wqkv_ref, bqkv_ref, wo_ref, bo_ref,
    ln2g_ref, ln2b_ref, wi_ref, bi_ref, w2_ref, b2_ref,
    y_ref, p_ref):
    # Per grid step (one batch element):
    #   x: (S, H)   mask: (NH, S, S) additive   pe: (S, S, D) rel-pos embeddings
    x = x_ref[...].astype(jnp.float32)
    pe = pe_ref[...].astype(jnp.float32)

    def layernorm(v, g, b):
        mu = jnp.mean(v, axis=-1, keepdims=True)
        var = jnp.mean((v - mu) ** 2, axis=-1, keepdims=True)
        return (v - mu) * jax.lax.rsqrt(var + LN_EPS) * g + b

    # ---- LayerNorm 1 + fused QKV projection (lane dim 96) ----
    xn = layernorm(x, ln1g_ref[...].astype(jnp.float32),
                   ln1b_ref[...].astype(jnp.float32))
    qkv = jnp.dot(xn, wqkv_ref[...], preferred_element_type=jnp.float32)
    qkv = qkv + bqkv_ref[...]                                     # (S, 3H)

    inv_sqrt_d = jnp.float32(1.0) / jnp.sqrt(jnp.float32(HEAD_DIM))

    # ---- attention, heads sliced on the lane axis ----
    ctx_heads = []
    for h in range(NUM_HEADS):
        lo = h * HEAD_DIM
        q_h = qkv[:, lo:lo + HEAD_DIM]                            # (S, D)
        k_h = qkv[:, HIDDEN + lo:HIDDEN + lo + HEAD_DIM]          # (S, D)
        v_h = qkv[:, 2 * HIDDEN + lo:2 * HIDDEN + lo + HEAD_DIM]  # (S, D)

        # q @ k.T without an in-kernel transpose (contract last dims).
        s = jax.lax.dot_general(q_h, k_h, (((1,), (1,)), ((), ())),
                                preferred_element_type=jnp.float32)   # (S, S)
        # relative_position_scores = einsum('ld,lrd->lr', q_h, pe)
        # (tiny at S=8/D=8; at scale route this through the MXU instead).
        rel = jnp.sum(q_h[:, None, :] * pe, axis=-1)                   # (S, S)

        s = (s + rel) * inv_sqrt_d + mask_ref[h].astype(jnp.float32)
        s = s - jnp.max(s, axis=-1, keepdims=True)
        e = jnp.exp(s)
        p = e * pl.reciprocal(jnp.sum(e, axis=-1, keepdims=True), approx=False)

        # probs kept in the natural (NH, S, S) layout (avoids a host-side
        # relayout; lane-dense packing only matters at much larger S).
        p_ref[h] = p.astype(p_ref.dtype)
        ctx_heads.append(jnp.dot(p, v_h, preferred_element_type=jnp.float32))

    # merge heads on the lane axis: (S, H) -- identical to permute+reshape.
    ctx = jnp.concatenate(ctx_heads, axis=-1)

    # ---- output projection + residual ----
    attn_out = jnp.dot(ctx, wo_ref[...], preferred_element_type=jnp.float32)
    attn_out = attn_out + bo_ref[...]
    h1 = x + attn_out

    # ---- LayerNorm 2 + MLP + residual ----
    h1n = layernorm(h1, ln2g_ref[...].astype(jnp.float32),
                    ln2b_ref[...].astype(jnp.float32))
    inter = jnp.dot(h1n, wi_ref[...], preferred_element_type=jnp.float32)
    inter = _gelu_tanh(inter + bi_ref[...])                         # (S, I)
    mlp = jnp.dot(inter, w2_ref[...], preferred_element_type=jnp.float32)
    mlp = mlp + b2_ref[...]

    y_ref[...] = (h1 + mlp).astype(y_ref.dtype)


def transformer_layer(x, mask4, pe, ln1g, ln1b, wqkv_t, bqkv, wo_t, bo,
                      ln2g, ln2b, wi_t, bi, w2_t, b2):
    """One fused transformer layer. x: [B,S,H] -> ([B,S,H], [B,NH,S,S])."""
    B, S, H = x.shape

    def full(a):  # whole-array block, constant index map
        return pl.BlockSpec(a.shape, lambda b, _nd=a.ndim: (0,) * _nd)

    return pl.pallas_call(
        _transformer_layer_kernel,
        out_shape=(
            jax.ShapeDtypeStruct((B, S, H), x.dtype),
            jax.ShapeDtypeStruct((B, NUM_HEADS, S, S), jnp.float32),
        ),
        grid=(B,),
        in_specs=[
            pl.BlockSpec((None, S, H), lambda b: (b, 0, 0)),
            pl.BlockSpec((None, NUM_HEADS, S, S), lambda b: (b, 0, 0, 0)),
            full(pe), full(ln1g), full(ln1b), full(wqkv_t), full(bqkv),
            full(wo_t), full(bo), full(ln2g), full(ln2b),
            full(wi_t), full(bi), full(w2_t), full(b2),
        ],
        out_specs=(
            pl.BlockSpec((None, S, H), lambda b: (b, 0, 0)),
            pl.BlockSpec((None, NUM_HEADS, S, S), lambda b: (b, 0, 0, 0)),
        ),
        compiler_params=pltpu.CompilerParams(
            dimension_semantics=("parallel",)),   # shards over TCs on v7x
    )(x, mask4, pe, ln1g, ln1b, wqkv_t, bqkv, wo_t, bo,
      ln2g, ln2b, wi_t, bi, w2_t, b2)


# ------------------------------ module wrapper --------------------------------
def init_params(key):
    layers = []
    std = 0.05
    for _ in range(NUM_LAYERS):
        key, *ks = jax.random.split(key, 18)
        ks = iter(ks)

        def nrm(shape, scale=std):
            return jax.random.normal(next(ks), shape, jnp.float32) * scale

        layers.append({
            "ln1_g": 1.0 + nrm((HIDDEN,), 0.1), "ln1_b": nrm((HIDDEN,), 0.1),
            "wq": nrm((HIDDEN, HIDDEN)), "bq": nrm((HIDDEN,)),
            "wk": nrm((HIDDEN, HIDDEN)), "bk": nrm((HIDDEN,)),
            "wv": nrm((HIDDEN, HIDDEN)), "bv": nrm((HIDDEN,)),
            "wo": nrm((HIDDEN, HIDDEN)), "bo": nrm((HIDDEN,)),
            "ln2_g": 1.0 + nrm((HIDDEN,), 0.1), "ln2_b": nrm((HIDDEN,), 0.1),
            "wi": nrm((INTERMEDIATE, HIDDEN)), "bi": nrm((INTERMEDIATE,)),
            "w2": nrm((HIDDEN, INTERMEDIATE)), "b2": nrm((HIDDEN,)),
            # nn.Parameter(torch.randn(2*MAX_TEXT_LENGTH - 1, head_dim))
            "rel_pos_enc": jax.random.normal(
                next(ks), (2 * MAX_TEXT_LENGTH - 1, HEAD_DIM), jnp.float32),
        })
    return {"layers": layers}


def cross_modal_encoder(params, hidden_states, attention_mask=None):
    """CrossModalEncoder.forward: returns (hidden_states, stacked attn probs)."""
    B, S, H = hidden_states.shape

    # Normalize attention_mask to an additive (B, NH, S, S) tensor.
    if attention_mask is None:
        mask4 = jnp.zeros((B, NUM_HEADS, S, S), hidden_states.dtype)
    else:
        m = attention_mask
        while m.ndim < 4:                       # e.g. (B,1,1,S) BERT-style
            m = m[:, None]
        mask4 = jnp.broadcast_to(m, (B, NUM_HEADS, S, S)).astype(
            hidden_states.dtype)

    # Relative-position distance table: constant for a fixed S.
    pos = jnp.arange(S)
    distance = pos[:, None] - pos[None, :] + S - 1       # in [0, 2S-2]

    x = hidden_states
    all_probs = []
    for lp in params["layers"]:
        # Host-side (one-off per call) weight packing: fused + pre-transposed
        # QKV, pre-transposed projections, pre-gathered rel-pos embeddings.
        pe = lp["rel_pos_enc"][distance]                   # (S, S, D)
        wqkv_t = jnp.concatenate([lp["wq"], lp["wk"], lp["wv"]], axis=0).T
        bqkv = jnp.concatenate([lp["bq"], lp["bk"], lp["bv"]]).reshape(1, -1)

        x, probs = transformer_layer(
            x, mask4, pe,
            lp["ln1_g"].reshape(1, -1), lp["ln1_b"].reshape(1, -1),
            wqkv_t, bqkv,
            lp["wo"].T, lp["bo"].reshape(1, -1),
            lp["ln2_g"].reshape(1, -1), lp["ln2_b"].reshape(1, -1),
            lp["wi"].T, lp["bi"].reshape(1, -1),
            lp["w2"].T, lp["b2"].reshape(1, -1))
        all_probs.append(probs)

    return x, jnp.stack(all_probs)        # (L, B, NH, S, S)


# -------------------------------- reference -----------------------------------
def reference(params, hidden_states, attention_mask=None):
    B, S, H = hidden_states.shape
    D = HEAD_DIM

    def ln(v, g, b):
        mu = jnp.mean(v, -1, keepdims=True)
        var = jnp.mean((v - mu) ** 2, -1, keepdims=True)
        return (v - mu) / jnp.sqrt(var + LN_EPS) * g + b

    m = None
    if attention_mask is not None:
        m = attention_mask
        while m.ndim < 4:
            m = m[:, None]

    pos = jnp.arange(S)
    distance = pos[:, None] - pos[None, :] + S - 1

    x = hidden_states
    all_probs = []
    for lp in params["layers"]:
        xn = ln(x, lp["ln1_g"], lp["ln1_b"])

        def split(t):
            return t.reshape(B, S, NUM_HEADS, D).transpose(0, 2, 1, 3)

        q = split(xn @ lp["wq"].T + lp["bq"])
        k = split(xn @ lp["wk"].T + lp["bk"])
        v = split(xn @ lp["wv"].T + lp["bv"])

        scores = jnp.einsum("bhld,bhrd->bhlr", q, k)
        pe = lp["rel_pos_enc"][distance]
        scores = scores + jnp.einsum("bhld,lrd->bhlr", q, pe)
        scores = scores / jnp.sqrt(jnp.float32(D))
        if m is not None:
            scores = scores + m
        probs = jax.nn.softmax(scores, axis=-1)
        ctx = jnp.einsum("bhlr,bhrd->bhld", probs, v)
        ctx = ctx.transpose(0, 2, 1, 3).reshape(B, S, H)
        x = x + (ctx @ lp["wo"].T + lp["bo"])

        xn2 = ln(x, lp["ln2_g"], lp["ln2_b"])
        inter = _gelu_tanh(xn2 @ lp["wi"].T + lp["bi"])
        x = x + (inter @ lp["w2"].T + lp["b2"])
        all_probs.append(probs)

    return x, jnp.stack(all_probs)


# ---------------------------------- main ---------------------------------------
if __name__ == "__main__":
    key = jax.random.PRNGKey(0)
    kp, kx = jax.random.split(key)
    params = init_params(kp)

    hidden_states = jax.random.normal(kx, (BATCH, SEQ, HIDDEN), jnp.float32)

    # Additive padding mask (BERT convention, shape (B,1,1,S)): batch 1 masks
    # its last two key positions.
    key_valid = jnp.ones((BATCH, SEQ), jnp.float32).at[1, SEQ - 2:].set(0.0)
    attention_mask = (1.0 - key_valid)[:, None, None, :] * -10000.0

    out, probs = cross_modal_encoder(params, hidden_states, attention_mask)
    out = jax.block_until_ready(out)
    probs = jax.block_until_ready(probs)

    ref_out, ref_probs = reference(params, hidden_states, attention_mask)
    assert out.shape == (BATCH, SEQ, HIDDEN)
    assert probs.shape == (NUM_LAYERS, BATCH, NUM_HEADS, SEQ, SEQ)
    assert jnp.allclose(out, ref_out, atol=1e-4, rtol=1e-4), \
        float(jnp.max(jnp.abs(out - ref_out)))
    assert jnp.allclose(probs, ref_probs, atol=1e-5, rtol=1e-5), \
        float(jnp.max(jnp.abs(probs - ref_probs)))

    # Also exercise the mask=None path.
    out2, probs2 = cross_modal_encoder(params, hidden_states, None)
    out2 = jax.block_until_ready(out2)
    ref_out2, ref_probs2 = reference(params, hidden_states, None)
    assert jnp.allclose(out2, ref_out2, atol=1e-4, rtol=1e-4)
    assert jnp.allclose(probs2, ref_probs2, atol=1e-5, rtol=1e-5)

    print("KERNEL_OK")
</pallas_src>

<mosaic_0001>
module attributes {stable_mosaic.version = 11 : i64} {
  func.func @_transformer_layer_kernel(%arg0: i32, %arg1: memref<1x8x32xf32, #tpu.memory_space<vmem>>, %arg2: memref<1x4x8x8xf32, #tpu.memory_space<vmem>>, %arg3: memref<8x8x8xf32, #tpu.memory_space<vmem>>, %arg4: memref<1x32xf32, #tpu.memory_space<vmem>>, %arg5: memref<1x32xf32, #tpu.memory_space<vmem>>, %arg6: memref<32x96xf32, #tpu.memory_space<vmem>>, %arg7: memref<1x96xf32, #tpu.memory_space<vmem>>, %arg8: memref<32x32xf32, #tpu.memory_space<vmem>>, %arg9: memref<1x32xf32, #tpu.memory_space<vmem>>, %arg10: memref<1x32xf32, #tpu.memory_space<vmem>>, %arg11: memref<1x32xf32, #tpu.memory_space<vmem>>, %arg12: memref<32x64xf32, #tpu.memory_space<vmem>>, %arg13: memref<1x64xf32, #tpu.memory_space<vmem>>, %arg14: memref<64x32xf32, #tpu.memory_space<vmem>>, %arg15: memref<1x32xf32, #tpu.memory_space<vmem>>, %arg16: memref<1x8x32xf32, #tpu.memory_space<vmem>>, %arg17: memref<1x4x8x8xf32, #tpu.memory_space<vmem>>) attributes {dimension_semantics = [#tpu.dimension_semantics<parallel>], iteration_bounds = array<i64: 2>, scalar_prefetch = 0 : i64, scratch_operands = 0 : i64, tpu.core_type = #tpu.core_type<tc>, window_params = [{transform_indices = @transform_0, window_bounds = array<i64: 1, 8, 32>}, {transform_indices = @transform_1, window_bounds = array<i64: 1, 4, 8, 8>}, {pipeline_mode = #tpu.pipeline_mode<synchronous>, transform_indices = @transform_2, window_bounds = array<i64: 8, 8, 8>}, {pipeline_mode = #tpu.pipeline_mode<synchronous>, transform_indices = @transform_3, window_bounds = array<i64: 1, 32>}, {pipeline_mode = #tpu.pipeline_mode<synchronous>, transform_indices = @transform_4, window_bounds = array<i64: 1, 32>}, {pipeline_mode = #tpu.pipeline_mode<synchronous>, transform_indices = @transform_5, window_bounds = array<i64: 32, 96>}, {pipeline_mode = #tpu.pipeline_mode<synchronous>, transform_indices = @transform_6, window_bounds = array<i64: 1, 96>}, {pipeline_mode = #tpu.pipeline_mode<synchronous>, transform_indices = @transform_7, window_bounds = array<i64: 32, 32>}, {pipeline_mode = #tpu.pipeline_mode<synchronous>, transform_indices = @transform_8, window_bounds = array<i64: 1, 32>}, {pipeline_mode = #tpu.pipeline_mode<synchronous>, transform_indices = @transform_9, window_bounds = array<i64: 1, 32>}, {pipeline_mode = #tpu.pipeline_mode<synchronous>, transform_indices = @transform_10, window_bounds = array<i64: 1, 32>}, {pipeline_mode = #tpu.pipeline_mode<synchronous>, transform_indices = @transform_11, window_bounds = array<i64: 32, 64>}, {pipeline_mode = #tpu.pipeline_mode<synchronous>, transform_indices = @transform_12, window_bounds = array<i64: 1, 64>}, {pipeline_mode = #tpu.pipeline_mode<synchronous>, transform_indices = @transform_13, window_bounds = array<i64: 64, 32>}, {pipeline_mode = #tpu.pipeline_mode<synchronous>, transform_indices = @transform_14, window_bounds = array<i64: 1, 32>}, {transform_indices = @transform_15, window_bounds = array<i64: 1, 8, 32>}, {transform_indices = @transform_16, window_bounds = array<i64: 1, 4, 8, 8>}]} {
    %c0 = arith.constant 0 : index
    %c0_0 = arith.constant 0 : index
    %c0_1 = arith.constant 0 : index
    %0 = vector.load %arg1[%c0, %c0_0, %c0_1] : memref<1x8x32xf32, #tpu.memory_space<vmem>>, vector<1x8x32xf32>
    %1 = vector.shape_cast %0 : vector<1x8x32xf32> to vector<8x32xf32>
    %c0_2 = arith.constant 0 : index
    %c0_3 = arith.constant 0 : index
    %c0_4 = arith.constant 0 : index
    %2 = vector.load %arg3[%c0_2, %c0_3, %c0_4] : memref<8x8x8xf32, #tpu.memory_space<vmem>>, vector<8x8x8xf32>
    %c0_5 = arith.constant 0 : index
    %c0_6 = arith.constant 0 : index
    %3 = vector.load %arg4[%c0_5, %c0_6] : memref<1x32xf32, #tpu.memory_space<vmem>>, vector<1x32xf32>
    %c0_7 = arith.constant 0 : index
    %c0_8 = arith.constant 0 : index
    %4 = vector.load %arg5[%c0_7, %c0_8] : memref<1x32xf32, #tpu.memory_space<vmem>>, vector<1x32xf32>
    %cst = arith.constant dense<0.000000e+00> : vector<8xf32>
    %5 = vector.multi_reduction <add>, %1, %cst [1] : vector<8x32xf32> to vector<8xf32>
    %6 = vector.shape_cast %5 : vector<8xf32> to vector<8x1xf32>
    %cst_9 = arith.constant 3.200000e+01 : f32
    %7 = vector.broadcast %cst_9 : f32 to vector<8x1xf32>
    %8 = arith.divf %6, %7 : vector<8x1xf32>
    %9 = vector.broadcast %8 : vector<8x1xf32> to vector<8x32xf32>
    %10 = arith.subf %1, %9 : vector<8x32xf32>
    %11 = arith.mulf %10, %10 : vector<8x32xf32>
    %cst_10 = arith.constant dense<0.000000e+00> : vector<8xf32>
    %12 = vector.multi_reduction <add>, %11, %cst_10 [1] : vector<8x32xf32> to vector<8xf32>
    %13 = vector.shape_cast %12 : vector<8xf32> to vector<8x1xf32>
    %cst_11 = arith.constant 3.200000e+01 : f32
    %14 = vector.broadcast %cst_11 : f32 to vector<8x1xf32>
    %15 = arith.divf %13, %14 : vector<8x1xf32>
    %16 = vector.broadcast %8 : vector<8x1xf32> to vector<8x32xf32>
    %17 = arith.subf %1, %16 : vector<8x32xf32>
    %cst_12 = arith.constant 9.99999996E-13 : f32
    %18 = vector.broadcast %cst_12 : f32 to vector<8x1xf32>
    %19 = arith.addf %15, %18 : vector<8x1xf32>
    %20 = math.rsqrt %19 : vector<8x1xf32>
    %21 = vector.broadcast %20 : vector<8x1xf32> to vector<8x32xf32>
    %22 = arith.mulf %17, %21 : vector<8x32xf32>
    %23 = vector.broadcast %3 : vector<1x32xf32> to vector<8x32xf32>
    %24 = arith.mulf %22, %23 : vector<8x32xf32>
    %25 = vector.broadcast %4 : vector<1x32xf32> to vector<8x32xf32>
    %26 = arith.addf %24, %25 : vector<8x32xf32>
    %c0_13 = arith.constant 0 : index
    %c0_14 = arith.constant 0 : index
    %27 = vector.load %arg6[%c0_13, %c0_14] : memref<32x96xf32, #tpu.memory_space<vmem>>, vector<32x96xf32>
    %cst_15 = arith.constant dense<0.000000e+00> : vector<8x96xf32>
    %28 = tpu.matmul %26, %27, %cst_15 {dimension_numbers = #tpu.dot_dimension_numbers<[1], [0], [0], [1], [0, 0, 1, 1], [], []>} : vector<8x32xf32>, vector<32x96xf32>, vector<8x96xf32> -> vector<8x96xf32>
    %c0_16 = arith.constant 0 : index
    %c0_17 = arith.constant 0 : index
    %29 = vector.load %arg7[%c0_16, %c0_17] : memref<1x96xf32, #tpu.memory_space<vmem>>, vector<1x96xf32>
    %30 = vector.broadcast %29 : vector<1x96xf32> to vector<8x96xf32>
    %31 = arith.addf %28, %30 : vector<8x96xf32>
    %cst_18 = arith.constant 8.000000e+00 : f32
    %32 = math.sqrt %cst_18 : f32
    %cst_19 = arith.constant 1.000000e+00 : f32
    %33 = arith.divf %cst_19, %32 : f32
    %34 = vector.extract_strided_slice %31 {offsets = [0, 0], sizes = [8, 8], strides = [1, 1]} : vector<8x96xf32> to vector<8x8xf32>
    %35 = vector.extract_strided_slice %31 {offsets = [0, 32], sizes = [8, 8], strides = [1, 1]} : vector<8x96xf32> to vector<8x8xf32>
    %36 = vector.extract_strided_slice %31 {offsets = [0, 64], sizes = [8, 8], strides = [1, 1]} : vector<8x96xf32> to vector<8x8xf32>
    %cst_20 = arith.constant dense<0.000000e+00> : vector<8x8xf32>
    %37 = tpu.matmul %34, %35, %cst_20 {dimension_numbers = #tpu.dot_dimension_numbers<[1], [1], [0], [0], [0, 0, 1, 0], [], []>} : vector<8x8xf32>, vector<8x8xf32>, vector<8x8xf32> -> vector<8x8xf32>
    %38 = vector.shape_cast %34 : vector<8x8xf32> to vector<8x1x8xf32>
    %39 = vector.broadcast %38 : vector<8x1x8xf32> to vector<8x8x8xf32>
    %40 = arith.mulf %39, %2 : vector<8x8x8xf32>
    %cst_21 = arith.constant dense<0.000000e+00> : vector<8x8xf32>
    %41 = vector.multi_reduction <add>, %40, %cst_21 [2] : vector<8x8x8xf32> to vector<8x8xf32>
    %42 = arith.addf %37, %41 : vector<8x8xf32>
    %43 = vector.broadcast %33 : f32 to vector<8x8xf32>
    %44 = arith.mulf %42, %43 : vector<8x8xf32>
    %c0_22 = arith.constant 0 : index
    %c0_23 = arith.constant 0 : index
    %c0_24 = arith.constant 0 : index
    %c0_25 = arith.constant 0 : index
    %45 = vector.load %arg2[%c0_22, %c0_23, %c0_24, %c0_25] : memref<1x4x8x8xf32, #tpu.memory_space<vmem>>, vector<1x1x8x8xf32>
    %46 = vector.shape_cast %45 : vector<1x1x8x8xf32> to vector<8x8xf32>
    %47 = arith.addf %44, %46 : vector<8x8xf32>
    %cst_26 = arith.constant dense<0xFF800000> : vector<8xf32>
    %48 = vector.multi_reduction <maximumf>, %47, %cst_26 [1] : vector<8x8xf32> to vector<8xf32>
    %49 = vector.shape_cast %48 : vector<8xf32> to vector<8x1xf32>
    %50 = vector.broadcast %49 : vector<8x1xf32> to vector<8x8xf32>
    %51 = arith.subf %47, %50 : vector<8x8xf32>
    %52 = math.exp %51 : vector<8x8xf32>
    %cst_27 = arith.constant dense<0.000000e+00> : vector<8xf32>
    %53 = vector.multi_reduction <add>, %52, %cst_27 [1] : vector<8x8xf32> to vector<8xf32>
    %54 = vector.shape_cast %53 : vector<8xf32> to vector<8x1xf32>
    %55 = tpu.reciprocal %54 : vector<8x1xf32> -> vector<8x1xf32>
    %56 = vector.broadcast %55 : vector<8x1xf32> to vector<8x8xf32>
    %57 = arith.mulf %52, %56 : vector<8x8xf32>
    %c0_28 = arith.constant 0 : index
    %c0_29 = arith.constant 0 : index
    %c0_30 = arith.constant 0 : index
    %c0_31 = arith.constant 0 : index
    %58 = vector.load %arg17[%c0_28, %c0_29, %c0_30, %c0_31] : memref<1x4x8x8xf32, #tpu.memory_space<vmem>>, vector<1x1x8x8xf32>
    %59 = vector.shape_cast %58 : vector<1x1x8x8xf32> to vector<8x8xf32>
    %60 = vector.shape_cast %57 : vector<8x8xf32> to vector<1x1x8x8xf32>
    tpu.vector_store %arg17[%c0_28, %c0_29, %c0_30, %c0_31], %60 {strides = array<i32>} : memref<1x4x8x8xf32, #tpu.memory_space<vmem>>, vector<1x1x8x8xf32>,
    %cst_32 = arith.constant dense<0.000000e+00> : vector<8x8xf32>
    %61 = tpu.matmul %57, %36, %cst_32 {dimension_numbers = #tpu.dot_dimension_numbers<[1], [0], [0], [1], [0, 0, 1, 1], [], []>} : vector<8x8xf32>, vector<8x8xf32>, vector<8x8xf32> -> vector<8x8xf32>
    %62 = vector.extract_strided_slice %31 {offsets = [0, 8], sizes = [8, 8], strides = [1, 1]} : vector<8x96xf32> to vector<8x8xf32>
    %63 = vector.extract_strided_slice %31 {offsets = [0, 40], sizes = [8, 8], strides = [1, 1]} : vector<8x96xf32> to vector<8x8xf32>
    %64 = vector.extract_strided_slice %31 {offsets = [0, 72], sizes = [8, 8], strides = [1, 1]} : vector<8x96xf32> to vector<8x8xf32>
    %cst_33 = arith.constant dense<0.000000e+00> : vector<8x8xf32>
    %65 = tpu.matmul %62, %63, %cst_33 {dimension_numbers = #tpu.dot_dimension_numbers<[1], [1], [0], [0], [0, 0, 1, 0], [], []>} : vector<8x8xf32>, vector<8x8xf32>, vector<8x8xf32> -> vector<8x8xf32>
    %66 = vector.shape_cast %62 : vector<8x8xf32> to vector<8x1x8xf32>
    %67 = vector.broadcast %66 : vector<8x1x8xf32> to vector<8x8x8xf32>
    %68 = arith.mulf %67, %2 : vector<8x8x8xf32>
    %cst_34 = arith.constant dense<0.000000e+00> : vector<8x8xf32>
    %69 = vector.multi_reduction <add>, %68, %cst_34 [2] : vector<8x8x8xf32> to vector<8x8xf32>
    %70 = arith.addf %65, %69 : vector<8x8xf32>
    %71 = vector.broadcast %33 : f32 to vector<8x8xf32>
    %72 = arith.mulf %70, %71 : vector<8x8xf32>
    %c0_35 = arith.constant 0 : index
    %c1 = arith.constant 1 : index
    %c0_36 = arith.constant 0 : index
    %c0_37 = arith.constant 0 : index
    %73 = vector.load %arg2[%c0_35, %c1, %c0_36, %c0_37] : memref<1x4x8x8xf32, #tpu.memory_space<vmem>>, vector<1x1x8x8xf32>
    %74 = vector.shape_cast %73 : vector<1x1x8x8xf32> to vector<8x8xf32>
    %75 = arith.addf %72, %74 : vector<8x8xf32>
    %cst_38 = arith.constant dense<0xFF800000> : vector<8xf32>
    %76 = vector.multi_reduction <maximumf>, %75, %cst_38 [1] : vector<8x8xf32> to vector<8xf32>
    %77 = vector.shape_cast %76 : vector<8xf32> to vector<8x1xf32>
    %78 = vector.broadcast %77 : vector<8x1xf32> to vector<8x8xf32>
    %79 = arith.subf %75, %78 : vector<8x8xf32>
    %80 = math.exp %79 : vector<8x8xf32>
    %cst_39 = arith.constant dense<0.000000e+00> : vector<8xf32>
    %81 = vector.multi_reduction <add>, %80, %cst_39 [1] : vector<8x8xf32> to vector<8xf32>
    %82 = vector.shape_cast %81 : vector<8xf32> to vector<8x1xf32>
    %83 = tpu.reciprocal %82 : vector<8x1xf32> -> vector<8x1xf32>
    %84 = vector.broadcast %83 : vector<8x1xf32> to vector<8x8xf32>
    %85 = arith.mulf %80, %84 : vector<8x8xf32>
    %c0_40 = arith.constant 0 : index
    %c1_41 = arith.constant 1 : index
    %c0_42 = arith.constant 0 : index
    %c0_43 = arith.constant 0 : index
    %86 = vector.load %arg17[%c0_40, %c1_41, %c0_42, %c0_43] : memref<1x4x8x8xf32, #tpu.memory_space<vmem>>, vector<1x1x8x8xf32>
    %87 = vector.shape_cast %86 : vector<1x1x8x8xf32> to vector<8x8xf32>
    %88 = vector.shape_cast %85 : vector<8x8xf32> to vector<1x1x8x8xf32>
    tpu.vector_store %arg17[%c0_40, %c1_41, %c0_42, %c0_43], %88 {strides = array<i32>} : memref<1x4x8x8xf32, #tpu.memory_space<vmem>>, vector<1x1x8x8xf32>,
    %cst_44 = arith.constant dense<0.000000e+00> : vector<8x8xf32>
    %89 = tpu.matmul %85, %64, %cst_44 {dimension_numbers = #tpu.dot_dimension_numbers<[1], [0], [0], [1], [0, 0, 1, 1], [], []>} : vector<8x8xf32>, vector<8x8xf32>, vector<8x8xf32> -> vector<8x8xf32>
    %90 = vector.extract_strided_slice %31 {offsets = [0, 16], sizes = [8, 8], strides = [1, 1]} : vector<8x96xf32> to vector<8x8xf32>
    %91 = vector.extract_strided_slice %31 {offsets = [0, 48], sizes = [8, 8], strides = [1, 1]} : vector<8x96xf32> to vector<8x8xf32>
    %92 = vector.extract_strided_slice %31 {offsets = [0, 80], sizes = [8, 8], strides = [1, 1]} : vector<8x96xf32> to vector<8x8xf32>
    %cst_45 = arith.constant dense<0.000000e+00> : vector<8x8xf32>
    %93 = tpu.matmul %90, %91, %cst_45 {dimension_numbers = #tpu.dot_dimension_numbers<[1], [1], [0], [0], [0, 0, 1, 0], [], []>} : vector<8x8xf32>, vector<8x8xf32>, vector<8x8xf32> -> vector<8x8xf32>
    %94 = vector.shape_cast %90 : vector<8x8xf32> to vector<8x1x8xf32>
    %95 = vector.broadcast %94 : vector<8x1x8xf32> to vector<8x8x8xf32>
    %96 = arith.mulf %95, %2 : vector<8x8x8xf32>
    %cst_46 = arith.constant dense<0.000000e+00> : vector<8x8xf32>
    %97 = vector.multi_reduction <add>, %96, %cst_46 [2] : vector<8x8x8xf32> to vector<8x8xf32>
    %98 = arith.addf %93, %97 : vector<8x8xf32>
    %99 = vector.broadcast %33 : f32 to vector<8x8xf32>
    %100 = arith.mulf %98, %99 : vector<8x8xf32>
    %c0_47 = arith.constant 0 : index
    %c2 = arith.constant 2 : index
    %c0_48 = arith.constant 0 : index
    %c0_49 = arith.constant 0 : index
    %101 = vector.load %arg2[%c0_47, %c2, %c0_48, %c0_49] : memref<1x4x8x8xf32, #tpu.memory_space<vmem>>, vector<1x1x8x8xf32>
    %102 = vector.shape_cast %101 : vector<1x1x8x8xf32> to vector<8x8xf32>
    %103 = arith.addf %100, %102 : vector<8x8xf32>
    %cst_50 = arith.constant dense<0xFF800000> : vector<8xf32>
    %104 = vector.multi_reduction <maximumf>, %103, %cst_50 [1] : vector<8x8xf32> to vector<8xf32>
    %105 = vector.shape_cast %104 : vector<8xf32> to vector<8x1xf32>
    %106 = vector.broadcast %105 : vector<8x1xf32> to vector<8x8xf32>
    %107 = arith.subf %103, %106 : vector<8x8xf32>
    %108 = math.exp %107 : vector<8x8xf32>
    %cst_51 = arith.constant dense<0.000000e+00> : vector<8xf32>
    %109 = vector.multi_reduction <add>, %108, %cst_51 [1] : vector<8x8xf32> to vector<8xf32>
    %110 = vector.shape_cast %109 : vector<8xf32> to vector<8x1xf32>
    %111 = tpu.reciprocal %110 : vector<8x1xf32> -> vector<8x1xf32>
    %112 = vector.broadcast %111 : vector<8x1xf32> to vector<8x8xf32>
    %113 = arith.mulf %108, %112 : vector<8x8xf32>
    %c0_52 = arith.constant 0 : index
    %c2_53 = arith.constant 2 : index
    %c0_54 = arith.constant 0 : index
    %c0_55 = arith.constant 0 : index
    %114 = vector.load %arg17[%c0_52, %c2_53, %c0_54, %c0_55] : memref<1x4x8x8xf32, #tpu.memory_space<vmem>>, vector<1x1x8x8xf32>
    %115 = vector.shape_cast %114 : vector<1x1x8x8xf32> to vector<8x8xf32>
    %116 = vector.shape_cast %113 : vector<8x8xf32> to vector<1x1x8x8xf32>
    tpu.vector_store %arg17[%c0_52, %c2_53, %c0_54, %c0_55], %116 {strides = array<i32>} : memref<1x4x8x8xf32, #tpu.memory_space<vmem>>, vector<1x1x8x8xf32>,
    %cst_56 = arith.constant dense<0.000000e+00> : vector<8x8xf32>
    %117 = tpu.matmul %113, %92, %cst_56 {dimension_numbers = #tpu.dot_dimension_numbers<[1], [0], [0], [1], [0, 0, 1, 1], [], []>} : vector<8x8xf32>, vector<8x8xf32>, vector<8x8xf32> -> vector<8x8xf32>
    %118 = vector.extract_strided_slice %31 {offsets = [0, 24], sizes = [8, 8], strides = [1, 1]} : vector<8x96xf32> to vector<8x8xf32>
    %119 = vector.extract_strided_slice %31 {offsets = [0, 56], sizes = [8, 8], strides = [1, 1]} : vector<8x96xf32> to vector<8x8xf32>
    %120 = vector.extract_strided_slice %31 {offsets = [0, 88], sizes = [8, 8], strides = [1, 1]} : vector<8x96xf32> to vector<8x8xf32>
    %cst_57 = arith.constant dense<0.000000e+00> : vector<8x8xf32>
    %121 = tpu.matmul %118, %119, %cst_57 {dimension_numbers = #tpu.dot_dimension_numbers<[1], [1], [0], [0], [0, 0, 1, 0], [], []>} : vector<8x8xf32>, vector<8x8xf32>, vector<8x8xf32> -> vector<8x8xf32>
    %122 = vector.shape_cast %118 : vector<8x8xf32> to vector<8x1x8xf32>
    %123 = vector.broadcast %122 : vector<8x1x8xf32> to vector<8x8x8xf32>
    %124 = arith.mulf %123, %2 : vector<8x8x8xf32>
    %cst_58 = arith.constant dense<0.000000e+00> : vector<8x8xf32>
    %125 = vector.multi_reduction <add>, %124, %cst_58 [2] : vector<8x8x8xf32> to vector<8x8xf32>
    %126 = arith.addf %121, %125 : vector<8x8xf32>
    %127 = vector.broadcast %33 : f32 to vector<8x8xf32>
    %128 = arith.mulf %126, %127 : vector<8x8xf32>
    %c0_59 = arith.constant 0 : index
    %c3 = arith.constant 3 : index
    %c0_60 = arith.constant 0 : index
    %c0_61 = arith.constant 0 : index
    %129 = vector.load %arg2[%c0_59, %c3, %c0_60, %c0_61] : memref<1x4x8x8xf32, #tpu.memory_space<vmem>>, vector<1x1x8x8xf32>
    %130 = vector.shape_cast %129 : vector<1x1x8x8xf32> to vector<8x8xf32>
    %131 = arith.addf %128, %130 : vector<8x8xf32>
    %cst_62 = arith.constant dense<0xFF800000> : vector<8xf32>
    %132 = vector.multi_reduction <maximumf>, %131, %cst_62 [1] : vector<8x8xf32> to vector<8xf32>
    %133 = vector.shape_cast %132 : vector<8xf32> to vector<8x1xf32>
    %134 = vector.broadcast %133 : vector<8x1xf32> to vector<8x8xf32>
    %135 = arith.subf %131, %134 : vector<8x8xf32>
    %136 = math.exp %135 : vector<8x8xf32>
    %cst_63 = arith.constant dense<0.000000e+00> : vector<8xf32>
    %137 = vector.multi_reduction <add>, %136, %cst_63 [1] : vector<8x8xf32> to vector<8xf32>
    %138 = vector.shape_cast %137 : vector<8xf32> to vector<8x1xf32>
    %139 = tpu.reciprocal %138 : vector<8x1xf32> -> vector<8x1xf32>
    %140 = vector.broadcast %139 : vector<8x1xf32> to vector<8x8xf32>
    %141 = arith.mulf %136, %140 : vector<8x8xf32>
    %c0_64 = arith.constant 0 : index
    %c3_65 = arith.constant 3 : index
    %c0_66 = arith.constant 0 : index
    %c0_67 = arith.constant 0 : index
    %142 = vector.load %arg17[%c0_64, %c3_65, %c0_66, %c0_67] : memref<1x4x8x8xf32, #tpu.memory_space<vmem>>, vector<1x1x8x8xf32>
    %143 = vector.shape_cast %142 : vector<1x1x8x8xf32> to vector<8x8xf32>
    %144 = vector.shape_cast %141 : vector<8x8xf32> to vector<1x1x8x8xf32>
    tpu.vector_store %arg17[%c0_64, %c3_65, %c0_66, %c0_67], %144 {strides = array<i32>} : memref<1x4x8x8xf32, #tpu.memory_space<vmem>>, vector<1x1x8x8xf32>,
    %cst_68 = arith.constant dense<0.000000e+00> : vector<8x8xf32>
    %145 = tpu.matmul %141, %120, %cst_68 {dimension_numbers = #tpu.dot_dimension_numbers<[1], [0], [0], [1], [0, 0, 1, 1], [], []>} : vector<8x8xf32>, vector<8x8xf32>, vector<8x8xf32> -> vector<8x8xf32>
    %146 = tpu.concatenate %61, %89, %117, %145 in 1 : vector<8x8xf32>, vector<8x8xf32>, vector<8x8xf32>, vector<8x8xf32> -> vector<8x32xf32>
    %c0_69 = arith.constant 0 : index
    %c0_70 = arith.constant 0 : index
    %147 = vector.load %arg8[%c0_69, %c0_70] : memref<32x32xf32, #tpu.memory_space<vmem>>, vector<32x32xf32>
    %cst_71 = arith.constant dense<0.000000e+00> : vector<8x32xf32>
    %148 = tpu.matmul %146, %147, %cst_71 {dimension_numbers = #tpu.dot_dimension_numbers<[1], [0], [0], [1], [0, 0, 1, 1], [], []>} : vector<8x32xf32>, vector<32x32xf32>, vector<8x32xf32> -> vector<8x32xf32>
    %c0_72 = arith.constant 0 : index
    %c0_73 = arith.constant 0 : index
    %149 = vector.load %arg9[%c0_72, %c0_73] : memref<1x32xf32, #tpu.memory_space<vmem>>, vector<1x32xf32>
    %150 = vector.broadcast %149 : vector<1x32xf32> to vector<8x32xf32>
    %151 = arith.addf %148, %150 : vector<8x32xf32>
    %152 = arith.addf %1, %151 : vector<8x32xf32>
    %c0_74 = arith.constant 0 : index
    %c0_75 = arith.constant 0 : index
    %153 = vector.load %arg10[%c0_74, %c0_75] : memref<1x32xf32, #tpu.memory_space<vmem>>, vector<1x32xf32>
    %c0_76 = arith.constant 0 : index
    %c0_77 = arith.constant 0 : index
    %154 = vector.load %arg11[%c0_76, %c0_77] : memref<1x32xf32, #tpu.memory_space<vmem>>, vector<1x32xf32>
    %cst_78 = arith.constant dense<0.000000e+00> : vector<8xf32>
    %155 = vector.multi_reduction <add>, %152, %cst_78 [1] : vector<8x32xf32> to vector<8xf32>
    %156 = vector.shape_cast %155 : vector<8xf32> to vector<8x1xf32>
    %cst_79 = arith.constant 3.200000e+01 : f32
    %157 = vector.broadcast %cst_79 : f32 to vector<8x1xf32>
    %158 = arith.divf %156, %157 : vector<8x1xf32>
    %159 = vector.broadcast %158 : vector<8x1xf32> to vector<8x32xf32>
    %160 = arith.subf %152, %159 : vector<8x32xf32>
    %161 = arith.mulf %160, %160 : vector<8x32xf32>
    %cst_80 = arith.constant dense<0.000000e+00> : vector<8xf32>
    %162 = vector.multi_reduction <add>, %161, %cst_80 [1] : vector<8x32xf32> to vector<8xf32>
    %163 = vector.shape_cast %162 : vector<8xf32> to vector<8x1xf32>
    %cst_81 = arith.constant 3.200000e+01 : f32
    %164 = vector.broadcast %cst_81 : f32 to vector<8x1xf32>
    %165 = arith.divf %163, %164 : vector<8x1xf32>
    %166 = vector.broadcast %158 : vector<8x1xf32> to vector<8x32xf32>
    %167 = arith.subf %152, %166 : vector<8x32xf32>
    %cst_82 = arith.constant 9.99999996E-13 : f32
    %168 = vector.broadcast %cst_82 : f32 to vector<8x1xf32>
    %169 = arith.addf %165, %168 : vector<8x1xf32>
    %170 = math.rsqrt %169 : vector<8x1xf32>
    %171 = vector.broadcast %170 : vector<8x1xf32> to vector<8x32xf32>
    %172 = arith.mulf %167, %171 : vector<8x32xf32>
    %173 = vector.broadcast %153 : vector<1x32xf32> to vector<8x32xf32>
    %174 = arith.mulf %172, %173 : vector<8x32xf32>
    %175 = vector.broadcast %154 : vector<1x32xf32> to vector<8x32xf32>
    %176 = arith.addf %174, %175 : vector<8x32xf32>
    %c0_83 = arith.constant 0 : index
    %c0_84 = arith.constant 0 : index
    %177 = vector.load %arg12[%c0_83, %c0_84] : memref<32x64xf32, #tpu.memory_space<vmem>>, vector<32x64xf32>
    %cst_85 = arith.constant dense<0.000000e+00> : vector<8x64xf32>
    %178 = tpu.matmul %176, %177, %cst_85 {dimension_numbers = #tpu.dot_dimension_numbers<[1], [0], [0], [1], [0, 0, 1, 1], [], []>} : vector<8x32xf32>, vector<32x64xf32>, vector<8x64xf32> -> vector<8x64xf32>
    %c0_86 = arith.constant 0 : index
    %c0_87 = arith.constant 0 : index
    %179 = vector.load %arg13[%c0_86, %c0_87] : memref<1x64xf32, #tpu.memory_space<vmem>>, vector<1x64xf32>
    %180 = vector.broadcast %179 : vector<1x64xf32> to vector<8x64xf32>
    %181 = arith.addf %178, %180 : vector<8x64xf32>
    %cst_88 = arith.constant 5.000000e-01 : f32
    %182 = vector.broadcast %cst_88 : f32 to vector<8x64xf32>
    %183 = arith.mulf %182, %181 : vector<8x64xf32>
    %cst_89 = arith.constant 4.471500e-02 : f32
    %184 = vector.broadcast %cst_89 : f32 to vector<8x64xf32>
    %185 = arith.mulf %184, %181 : vector<8x64xf32>
    %186 = arith.mulf %185, %181 : vector<8x64xf32>
    %187 = arith.mulf %186, %181 : vector<8x64xf32>
    %188 = arith.addf %181, %187 : vector<8x64xf32>
    %cst_90 = arith.constant 0.797884583 : f32
    %189 = vector.broadcast %cst_90 : f32 to vector<8x64xf32>
    %190 = arith.mulf %189, %188 : vector<8x64xf32>
    %191 = math.tanh %190 : vector<8x64xf32>
    %cst_91 = arith.constant 1.000000e+00 : f32
    %192 = vector.broadcast %cst_91 : f32 to vector<8x64xf32>
    %193 = arith.addf %192, %191 : vector<8x64xf32>
    %194 = arith.mulf %183, %193 : vector<8x64xf32>
    %c0_92 = arith.constant 0 : index
    %c0_93 = arith.constant 0 : index
    %195 = vector.load %arg14[%c0_92, %c0_93] : memref<64x32xf32, #tpu.memory_space<vmem>>, vector<64x32xf32>
    %cst_94 = arith.constant dense<0.000000e+00> : vector<8x32xf32>
    %196 = tpu.matmul %194, %195, %cst_94 {dimension_numbers = #tpu.dot_dimension_numbers<[1], [0], [0], [1], [0, 0, 1, 1], [], []>} : vector<8x64xf32>, vector<64x32xf32>, vector<8x32xf32> -> vector<8x32xf32>
    %c0_95 = arith.constant 0 : index
    %c0_96 = arith.constant 0 : index
    %197 = vector.load %arg15[%c0_95, %c0_96] : memref<1x32xf32, #tpu.memory_space<vmem>>, vector<1x32xf32>
    %198 = vector.broadcast %197 : vector<1x32xf32> to vector<8x32xf32>
    %199 = arith.addf %196, %198 : vector<8x32xf32>
    %200 = arith.addf %152, %199 : vector<8x32xf32>
    %c0_97 = arith.constant 0 : index
    %c0_98 = arith.constant 0 : index
    %c0_99 = arith.constant 0 : index
    %201 = vector.load %arg16[%c0_97, %c0_98, %c0_99] : memref<1x8x32xf32, #tpu.memory_space<vmem>>, vector<1x8x32xf32>
    %202 = vector.shape_cast %201 : vector<1x8x32xf32> to vector<8x32xf32>
    %203 = vector.shape_cast %200 : vector<8x32xf32> to vector<1x8x32xf32>
    tpu.vector_store %arg16[%c0_97, %c0_98, %c0_99], %203 {strides = array<i32>} : memref<1x8x32xf32, #tpu.memory_space<vmem>>, vector<1x8x32xf32>,
    return
  }
  func.func @transform_0(%arg0: i32) -> (i32, i32, i32) {
    %c0_i32 = arith.constant 0 : i32
    %c0_i32_0 = arith.constant 0 : i32
    %c0_i32_1 = arith.constant 0 : i32
    return %arg0, %c0_i32, %c0_i32_0 : i32, i32, i32
  }
  func.func @transform_1(%arg0: i32) -> (i32, i32, i32, i32) {
    %c0_i32 = arith.constant 0 : i32
    %c0_i32_0 = arith.constant 0 : i32
    %c0_i32_1 = arith.constant 0 : i32
    %c0_i32_2 = arith.constant 0 : i32
    return %arg0, %c0_i32, %c0_i32_0, %c0_i32_1 : i32, i32, i32, i32
  }
  func.func @transform_2(%arg0: i32) -> (i32, i32, i32) {
    %c0_i32 = arith.constant 0 : i32
    %c0_i32_0 = arith.constant 0 : i32
    %c0_i32_1 = arith.constant 0 : i32
    %c0_i32_2 = arith.constant 0 : i32
    return %c0_i32, %c0_i32_0, %c0_i32_1 : i32, i32, i32
  }
  func.func @transform_3(%arg0: i32) -> (i32, i32) {
    %c0_i32 = arith.constant 0 : i32
    %c0_i32_0 = arith.constant 0 : i32
    %c0_i32_1 = arith.constant 0 : i32
    return %c0_i32, %c0_i32_0 : i32, i32
  }
  func.func @transform_4(%arg0: i32) -> (i32, i32) {
    %c0_i32 = arith.constant 0 : i32
    %c0_i32_0 = arith.constant 0 : i32
    %c0_i32_1 = arith.constant 0 : i32
    return %c0_i32, %c0_i32_0 : i32, i32
  }
  func.func @transform_5(%arg0: i32) -> (i32, i32) {
    %c0_i32 = arith.constant 0 : i32
    %c0_i32_0 = arith.constant 0 : i32
    %c0_i32_1 = arith.constant 0 : i32
    return %c0_i32, %c0_i32_0 : i32, i32
  }
  func.func @transform_6(%arg0: i32) -> (i32, i32) {
    %c0_i32 = arith.constant 0 : i32
    %c0_i32_0 = arith.constant 0 : i32
    %c0_i32_1 = arith.constant 0 : i32
    return %c0_i32, %c0_i32_0 : i32, i32
  }
  func.func @transform_7(%arg0: i32) -> (i32, i32) {
    %c0_i32 = arith.constant 0 : i32
    %c0_i32_0 = arith.constant 0 : i32
    %c0_i32_1 = arith.constant 0 : i32
    return %c0_i32, %c0_i32_0 : i32, i32
  }
  func.func @transform_8(%arg0: i32) -> (i32, i32) {
    %c0_i32 = arith.constant 0 : i32
    %c0_i32_0 = arith.constant 0 : i32
    %c0_i32_1 = arith.constant 0 : i32
    return %c0_i32, %c0_i32_0 : i32, i32
  }
  func.func @transform_9(%arg0: i32) -> (i32, i32) {
    %c0_i32 = arith.constant 0 : i32
    %c0_i32_0 = arith.constant 0 : i32
    %c0_i32_1 = arith.constant 0 : i32
    return %c0_i32, %c0_i32_0 : i32, i32
  }
  func.func @transform_10(%arg0: i32) -> (i32, i32) {
    %c0_i32 = arith.constant 0 : i32
    %c0_i32_0 = arith.constant 0 : i32
    %c0_i32_1 = arith.constant 0 : i32
    return %c0_i32, %c0_i32_0 : i32, i32
  }
  func.func @transform_11(%arg0: i32) -> (i32, i32) {
    %c0_i32 = arith.constant 0 : i32
    %c0_i32_0 = arith.constant 0 : i32
    %c0_i32_1 = arith.constant 0 : i32
    return %c0_i32, %c0_i32_0 : i32, i32
  }
  func.func @transform_12(%arg0: i32) -> (i32, i32) {
    %c0_i32 = arith.constant 0 : i32
    %c0_i32_0 = arith.constant 0 : i32
    %c0_i32_1 = arith.constant 0 : i32
    return %c0_i32, %c0_i32_0 : i32, i32
  }
  func.func @transform_13(%arg0: i32) -> (i32, i32) {
    %c0_i32 = arith.constant 0 : i32
    %c0_i32_0 = arith.constant 0 : i32
    %c0_i32_1 = arith.constant 0 : i32
    return %c0_i32, %c0_i32_0 : i32, i32
  }
  func.func @transform_14(%arg0: i32) -> (i32, i32) {
    %c0_i32 = arith.constant 0 : i32
    %c0_i32_0 = arith.constant 0 : i32
    %c0_i32_1 = arith.constant 0 : i32
    return %c0_i32, %c0_i32_0 : i32, i32
  }
  func.func @transform_15(%arg0: i32) -> (i32, i32, i32) {
    %c0_i32 = arith.constant 0 : i32
    %c0_i32_0 = arith.constant 0 : i32
    %c0_i32_1 = arith.constant 0 : i32
    return %arg0, %c0_i32, %c0_i32_0 : i32, i32, i32
  }
  func.func @transform_16(%arg0: i32) -> (i32, i32, i32, i32) {
    %c0_i32 = arith.constant 0 : i32
    %c0_i32_0 = arith.constant 0 : i32
    %c0_i32_1 = arith.constant 0 : i32
    %c0_i32_2 = arith.constant 0 : i32
    return %arg0, %c0_i32, %c0_i32_0, %c0_i32_1 : i32, i32, i32, i32
  }
}

</mosaic_0001>

<bundles_post_ra>
// kernel: tpu_custom_call.1
= control target key start
LH: loop header
LB: loop body
LE: loop exit
PB: predicated region body
PF: predicated region fallthrough
CT: control target
= control target key end

     0   :  { %s3804_s0 = inlined_call_operand.hbm [shape: f32[2,8,32], index: 0, kind: input, shape index: {}]   ;;  %s3805_s1 = inlined_call_operand.vmem [shape: f32[2,4,8,8], index: 1, kind: input, shape index: {}]   ;;  %s3806_s2 = inlined_call_operand.hbm [shape: f32[8,8,8], index: 2, kind: input, shape index: {}]   ;;  %s3807_s3 = inlined_call_operand.vmem [shape: f32[1,32], index: 3, kind: input, shape index: {}]   ;;  %s3808_s4 = inlined_call_operand.vmem [shape: f32[1,32], index: 4, kind: input, shape index: {}]   ;;  %s3809_s5 = inlined_call_operand.vmem [shape: f32[32,96], index: 5, kind: input, shape index: {}]   ;;  %s3810_s6 = inlined_call_operand.vmem [shape: f32[1,96], index: 6, kind: input, shape index: {}]   ;;  %s3811_s7 = inlined_call_operand.hbm [shape: f32[32,32], index: 7, kind: input, shape index: {}]   ;;  %s3812_s8 = inlined_call_operand.vmem [shape: f32[1,32], index: 8, kind: input, shape index: {}]   ;;  %s3813_s9 = inlined_call_operand.vmem [shape: f32[1,32], index: 9, kind: input, shape index: {}]   ;;  %s3814_s10 = inlined_call_operand.vmem [shape: f32[1,32], index: 10, kind: input, shape index: {}]   ;;  %s3815_s11 = inlined_call_operand.hbm [shape: f32[32,64], index: 11, kind: input, shape index: {}]   ;;  %s3816_s12 = inlined_call_operand.vmem [shape: f32[1,64], index: 12, kind: input, shape index: {}]   ;;  %s3817_s13 = inlined_call_operand.vmem [shape: f32[64,32], index: 13, kind: input, shape index: {}]   ;;  %s3818_s14 = inlined_call_operand.vmem [shape: f32[1,32], index: 14, kind: input, shape index: {}]   ;;  %s3819_s15 = inlined_call_operand.hbm [shape: f32[2,8,32], index: 15, kind: output, shape index: {0}]   ;;  %s3820_s16 = inlined_call_operand.hbm [shape: f32[2,4,8,8], index: 16, kind: output, shape index: {1}]  }
   0x1   :  { %3834 = sst [smem:[#allocation24_spill]] %s3804_s0 }
   0x2   :  { %3835 = sst [smem:[#allocation25_spill]] %s3806_s2 }
   0x3   :  { %3836 = sst [smem:[#allocation26_spill]] %s3811_s7 }
   0x4   :  { %3837 = sst [smem:[#allocation27_spill]] %s3815_s11 }
   0x5   :  { %3838 = sst [smem:[#allocation28_spill]] %s3818_s14 }
   0x6   :  { %3839 = sst [smem:[#allocation29_spill]] %s3819_s15 }
   0x7   :  { %22 = vsyncpa [#allocation3], 0 }
   0x8   :  { %24 = vsyncpa [#allocation3 + $0x1], 0 }
   0x9   :  { %25 = vsyncpa [#allocation6], 0 }
   0xa   :  { %26 = vsyncpa [#allocation9], 0 }
   0xb   :  { %27 = vsyncpa [#allocation4], 0 }
   0xc   :  { %29 = vsyncpa [#allocation4 + $0x1], 0 }
   0xd   :  { %30 = vsyncpa [#allocation12], 0 }
   0xe   :  { %32 = vsyncpa [#allocation12 + $0x1], 0  ;;  %s3139_s21 = smov 0   ;;  %s3141_s22 = smov 0  }
   0xf   :  { %s3143_s23 = smov 0   ;;  %s3145_s24 = smov 0  }
  0x10 LB: > { %3840 = sst [smem:[#allocation18_spill]] %s3014_s21  ;;  %s3160_s25 = sadd.s32 4294967295, %s3026_s24   ;;  %s3026_s24 = sphi %s3145_s24, %s3871_s24   ;;  %s3022_s23 = sphi %s3143_s23, %s3873_s23   ;;  %s3018_s22 = sphi %s3141_s22, %s3875_s22   ;;  %s3014_s21 = sphi %s3139_s21, %s3874_s21  }
  0x11   : > { %3841 = sst [smem:[#allocation19_spill]] %s3022_s23  ;;  %s2505_s26 = sadd.s32 4294967294, %s3026_s24  }
  0x12   : > { %3842 = sst [smem:[#allocation20_spill]] %s3026_s24  ;;  %p58_p0 = scmp.ne.s32.totalorder %s3018_s22, %s3014_s21 }
  0x13   : > { %p3825_p1 = scmp.eq.s32.totalorder %s3160_s25, 0  ;;  %p387_p3 = scmp.eq.s32.totalorder %s2505_s26, 1 }
  0x14   : > { %p2506_p5 = scmp.ge.s32.totalorder %s3026_s24, 1  ;;  %p420_p7 = scmp.lt.s32.totalorder %s3026_s24, 3 }
  0x15   : > { %p3169_p4 = por %p3825_p1, %p58_p0  ;;  %p3174_p6 = por %p387_p3, %p58_p0 }
  0x16   : > { %p3179_p8 = pnand %p2506_p5, %p420_p7  ;;  %s3028_s30 = smov [#allocation5]  }
  0x17   : > { %s3843_s27 = scalar_select %p3169_p4, 1, 0 }
  0x18   : > { %s3844_s28 = scalar_select %p3174_p6, 1, 0 }
  0x19   : > { %s3846_s29 = scalar_select %p3179_p8, 1, 0 }
  0x1a   : > { %3845 = sst [smem:[#allocation21_spill]] %s3844_s28  ;;  %s432_s0 = sshll.u32 %s3028_s30, 4  ;;  %s433_s0 = int_to_ptr.vmem [resolvable:$true] %s432_s0 }
  0x1b   : > { %p2711_p9 = pneg %p3179_p8  ;;  %s3029_s18 = smov [#allocation7]  }
  0x1c   : > { %s457_s19 = sshll.u32 %s3029_s18, 4  ;;  %s3030_s20 = smov [#allocation8]   ;;  %s458_s19 = int_to_ptr.vmem [resolvable:$true] %s457_s19 }
  0x1d   : > { %p3188_p11 = pnand %p2711_p9, %p3825_p1  ;;  %s479_s26 = sshll.u32 %s3030_s20, 4  ;;  %s480_s26 = int_to_ptr.vmem [resolvable:$true] %s479_s26 }
  0x1e   : > { %s2829_s28 = scalar_lea.vmem %s433_s0, 1024  ;;  %p2837_p5 = scmp.lt.s32.totalorder %s433_s0, %s433_s0 }
  0x1f   : > { %p2820_p12 = pneg %p3188_p11  ;;  %p2830_p13 = scmp.ne.s32.totalorder %s433_s0, %s2829_s28 }
  0x20   : > { %p2838_p7 = scmp.lt.s32.totalorder %s2829_s28, %s2829_s28 }
  0x21   : > { %p2832_p0 = pnand %p2830_p13, %p2820_p12 }
  0x22   : > { %p2839_p9 = por %p2838_p7, %p2837_p5 }
  0x23   : > { %p2833_p3 = pneg %p2832_p0 }
  0x25   : > { %p2840_p10 = pnand %p2839_p9, %p2833_p3 }
  0x27   : > { %2843 = shalt.err (!%p2840_p10)
}
  0x28   : > { %s3031_s30 = smov 128   ;;  %s3032_s18 = smov 8  }
  0x29   : > { %s3848_s2 = sld [smem:[#allocation25_spill]]  ;;  %s2855_s15 = scalar_lea.vmem %s458_s19, 512 }
  0x2a   : > { %p2856_p1 = scmp.ne.s32.totalorder %s458_s19, %s2855_s15  ;;  %p2863_p2 = scmp.lt.s32.totalorder %s458_s19, %s458_s19 }
  0x2b   : > { %p2864_p6 = scmp.lt.s32.totalorder %s2855_s15, %s2855_s15 }
  0x2c   : > { %p2858_p13 = pnand %p2856_p1, %p2820_p12 }
  0x2d   : > { %p2865_p5 = por %p2864_p6, %p2863_p2 }
  0x2e   : > { %p2859_p0 = pneg %p2858_p13 }
  0x2f   : > { %2714 = dma.hbm_to_vmem [thread:$0]  (!%p3188_p11), %s3848_s2, 1024, %s433_s0, [#allocation6], %s3031_s30, %s3031_s30, %s3032_s18  }
  0x30   : > { %p2866_p3 = pnand %p2865_p5, %p2859_p0 }
  0x32   : > { %2869 = shalt.err (!%p2866_p3)
}
  0x33   : > { %s3849_s7 = sld [smem:[#allocation26_spill]]  ;;  %s2881_s21 = scalar_lea.vmem %s480_s26, 512 }
  0x34   : > { %p2882_p10 = scmp.ne.s32.totalorder %s480_s26, %s2881_s21  ;;  %p2889_p9 = scmp.lt.s32.totalorder %s480_s26, %s480_s26 }
  0x35   : > { %p2890_p13 = scmp.lt.s32.totalorder %s2881_s21, %s2881_s21 }
  0x36   : > { %p2884_p7 = pnand %p2882_p10, %p2820_p12 }
  0x37   : > { %p2891_p4 = por %p2890_p13, %p2889_p9 }
  0x38   : > { %p2885_p1 = pneg %p2884_p7 }
  0x39   : > { %2717 = dma.hbm_to_vmem [thread:$0]  (!%p3188_p11), %s3849_s7, 512, %s458_s19, [#allocation6], %s3031_s30, %s3031_s30, %s3032_s18  }
  0x3a   : > { %p2892_p2 = pnand %p2891_p4, %p2885_p1 }
  0x3c   : > { %2895 = shalt.err (!%p2892_p2)
}
  0x3d   : > { %s3850_s11 = sld [smem:[#allocation27_spill]]  ;;  %s3219_s14 = sadd.s32 1, %s3026_s24  }
  0x3e   : > { %3851 = sst [smem:[#allocation22_spill]] %s3219_s14  ;;  %s42_s19 = ssub.s32 %s3026_s24, %s3219_s14 }
  0x3f   : > { %s45_s17 = sadd.s32 1, %s3022_s23  ;;  %p43_p4 = scmp.eq.s32.totalorder %s42_s19, 0 }
  0x40   : > { %p52_p6 = scmp.ne.s32.totalorder %s3022_s23, %s3018_s22  ;;  %p53_p12 = scmp.eq.s32.totalorder %s3026_s24, 0 }
  0x41   : > { %p2735_p0 = scmp.lt.s32.totalorder %s3026_s24, 2  ;;  %p3853_p3 = scmp.eq.s32.totalorder %s3160_s25, 1 }
  0x42   : > { %s3229_s20 = scalar_select %p43_p4, %s3022_s23, %s45_s17  }
  0x43   : > { %2720 = dma.hbm_to_vmem [thread:$0]  (!%p3188_p11), %s3850_s11, 512, %s480_s26, [#allocation9], %s3031_s30, %s3031_s30, %s3032_s18  }
  0x44   : > { %3852 = sst [smem:[#allocation23_spill]] %s3229_s20  ;;  %p54_p5 = por %p53_p12, %p52_p6 }
  0x45   : > { %p3233_p10 = por %p3853_p3, %p52_p6  ;;  %s502_s21 = sand.u32 1, %s3022_s23  }
  0x46   : > { %s2512_s15 = sshll.u32 %s3026_s24, 7  ;;  %s2511_s26 = sshll.u32 %s502_s21, 3 }
  0x47   : > { %s3854_s28 = scalar_select %p3233_p10, 1, 0 }
  0x48   : > { %s3855_s0 = sld [smem:[#allocation24_spill]]  ;;  %s506_s19 = scalar_lea.vmem [#allocation2], %s2511_s26 }
  0x49   : > { %s513_s17 = sshll.u32 %s506_s19, 4  ;;  %p3244_p11 = pnand %p2735_p0, %p54_p5  ;;  %s514_s17 = int_to_ptr.vmem [resolvable:$true] %s513_s17 }
  0x4a   : > { %s503_s11 = scalar_lea.sflag [#allocation3], %s502_s21 }
  0x4b   : > { %p2898_p1 = pneg %p3244_p11 }
  0x4e   : > { %s3242_s2 = scalar_lea.hbm %s3855_s0, %s2512_s15  ;;  %s2901_s18 = scalar_lea.hbm %s3855_s0, 256 }
  0x4f   : > { %s2896_s20 = scalar_lea.hbm %s3242_s2, 128  ;;  %p2902_p2 = scmp.lt.s32.totalorder %s3242_s2, %s3855_s0 }
  0x50   : > { %p2897_p7 = scmp.ne.s32.totalorder %s3242_s2, %s2896_s20  ;;  %p2903_p4 = scmp.lt.s32.totalorder %s2901_s18, %s2896_s20 }
  0x52   : > { %p2899_p9 = pnand %p2898_p1, %p2897_p7  ;;  %p2904_p6 = por %p2903_p4, %p2902_p2 }
  0x54   : > { %p2900_p13 = pneg %p2899_p9 }
  0x56   : > { %p2905_p12 = pnand %p2904_p6, %p2900_p13 }
  0x58   : > { %2908 = shalt.err (!%p2905_p12)
}
  0x59   : > { %s2909_s19 = scalar_lea.vmem %s514_s17, 128  ;;  %s3033_s21 = smov [#allocation2]  }
  0x5a   : > { %p2910_p0 = scmp.ne.s32.totalorder %s514_s17, %s2909_s19  ;;  %s2914_s14 = sshll.u32 %s3033_s21, 4  ;;  %s2915_s14 = int_to_ptr.vmem [resolvable:$false] %s2914_s14 }
  0x5b   : > { %s2916_s24 = scalar_lea.vmem %s2915_s14, 256  ;;  %p2917_p7 = scmp.lt.s32.totalorder %s514_s17, %s2915_s14 }
  0x5c   : > { %p2912_p5 = pnand %p2910_p0, %p2898_p1  ;;  %p2918_p9 = scmp.lt.s32.totalorder %s2916_s24, %s2909_s19 }
  0x5e   : > { %p2913_p3 = pneg %p2912_p5  ;;  %p2919_p10 = por %p2918_p9, %p2917_p7 }
  0x60   : > { %p2920_p8 = pnand %p2919_p10, %p2913_p3 }
  0x62   : > { %2923 = shalt.err (!%p2920_p8)
}
  0x63   : > { %2724 = dma.hbm_to_vmem [thread:$0]  (!%p3244_p11), %s3242_s2, 128, %s514_s17, %s503_s11  }
  0x64   : > { %p3857_p13 = scmp.ne.s32.totalorder %s3846_s29, 0 }
  0x65   : > { %s3265_s23 = sand.u32 (!%p3857_p13), 1, %s3018_s22   ;;  %p3858_p8 = scmp.ne.s32.totalorder (!%p3857_p13), %s3843_s27, 0 }
  0x66   : > { %530 = sbr.rel (%p3857_p13) target bundleno = 2654 (0xa5e), region = 80  ;;  %s2514_s20 = sshll.u32 (!%p3857_p13), %s3265_s23, 3 }
  0x67   : > { %s533_s14 = scalar_lea.sflag (!%p3857_p13), [#allocation3], %s3265_s23  ;;  %s3271_s24 = scalar_lea.vmem (!%p3857_p13), [#allocation2], %s2514_s20 }
  0x6b   : > { %2993 = dma.done.wait (%p3858_p8), %s533_s14, 128  }
  0x6c   : > { %2995 = vsyncadd (%p3858_p8), %s533_s14, 4294967168  ;;  %p3859_p10 = scmp.eq.s32.totalorder %s3160_s25, 0 }
  0x6e   : > { %2997 = dma.done.wait (%p3859_p10), [#allocation6], 1536   ;;  %p3860_p11 = pmov %p3859_p10 }
  0x6f   : > { %p3861_p1 = pmov %p3859_p10 }
  0x70   : > { %2999 = vsyncadd (%p3860_p11), [#allocation6], 4294965760 }
  0x71   : > { %3001 = dma.done.wait (%p3861_p1), [#allocation9], 512   ;;  %p3862_p2 = pmov %p3861_p1 }
  0x72   : > { %vm623_vm0 = vcmask 261120   ;;  %v612_v0 = vld [vmem:[%s3271_s24] sm:$0xff]  ;;  %v655_v7 = vld [vmem:[%s3809_s5 + $0x18] sm:$0xff]  ;;  %v3034_v8 = vmov 0.0   ;;  %v654_v9 = vld [vmem:[%s3809_s5 + $0x10] sm:$0xff]  ;;  %vm3035_vm1 = vmmov 0   ;;  %v741_v29 = vlaneseq }
  0x73   : > { %3003 = vsyncadd (%p3862_p2), [#allocation9], 4294966784  ;;  %v624_v1 = vsel %vm623_vm0, %v612_v0, 0.0  ;;  %2601 = vmatprep.subr.mxu1 %v3034_v8  ;;  %2609 = vmatprep.mubr.msk.f32.mxu1 %vm3035_vm1, %v3034_v8  ;;  %v653_v10 = vld [vmem:[%s3809_s5 + $0x8] sm:$0xff]  ;;  %v652_v11 = vld [vmem:[%s3809_s5] sm:$0xff]  ;;  %s3036_s18 = smov 8  }
  0x74   : > { %625 = vadd.xlane.f32.xlu0 %v624_v1  ;;  %2602 = vmatpush3.msra.mxu1 %v655_v7  ;;  %v3314_v12 = vld [vmem:[#allocation5] sm:$0xff]  ;;  %v3316_v13 = vld [vmem:[#allocation5 + $0x10] sm:$0xff]  ;;  %v3322_v14 = vld [vmem:[#allocation5 + $0x8] sm:$0xff]  ;;  %s3037_s26 = smov 16   ;;  %s3038_s19 = smov 24   ;;  %v742_v30 = vshrl.u32 %v741_v29, 7 }
  0x75   : > { %2622 = vmatprep.subr.mxu0 %v3034_v8  ;;  %2603 = vmatprep.subr.mxu1 %v3034_v8  ;;  %v3324_v15 = vld [vmem:[#allocation5 + $0x20] sm:$0xff]  ;;  %v3330_v16 = vld [vmem:[#allocation5 + $0x18] sm:$0xff]  ;;  %v3336_v17 = vld [vmem:[#allocation5 + $0x28] sm:$0xff]  ;;  %v870_v31 = vand.u32 127, %v741_v29  ;;  %v3039_v38 = vmov 1966171168  }
  0x76   : > { %2624 = vmatprep.mubr.msk.f32.mxu0 %vm3035_vm1, %v3034_v8  ;;  %2604 = vmatpush3.msra.mxu1 %v654_v9  ;;  %v3338_v18 = vld [vmem:[#allocation5 + $0x30] sm:$0xff]  ;;  %v3344_v19 = vld [vmem:[#allocation5 + $0x38] sm:$0xff]  ;;  %v739_v39 = vunpack.c.l.s4 %v3039_v38  ;;  %s3040_s29 = smov 120   ;;  %s3041_s17 = smov 96   ;;  %v788_v53 = vsub.s32 0, %v742_v30  ;;  %vm834_vm2 = vcmask 64512  }
  0x77   : > { %2605 = vmatprep.subr.mxu1 %v3034_v8  ;;  %1091 = vrot.lane.b32.xlu1 %v3314_v12, %s3036_s18  ;;  %v2522_v24 = vld [vmem:[%s3807_s3] ss:$0 sm:$0xff]  ;;  %v3388_v32 = vsub.s32 %v870_v31, %v742_v30  ;;  %s3042_s15 = smov 88   ;;  %s3043_s30 = smov 80   ;;  %vm903_vm3 = vcmask 1041409   ;;  %vm905_vm4 = vcmask 1042434  }
  0x78   : > { %2606 = vmatpush3.msra.mxu1 %v653_v10  ;;  %v2523_v26 = vld [vmem:[%s3808_s4] ss:$0 sm:$0xff]  ;;  %v740_v42 = vunpack.c.0.s8 %v739_v39  ;;  %s3044_s21 = smov 112   ;;  %s3045_s14 = smov 72   ;;  %vm907_vm5 = vcmask 1043459   ;;  %vm909_vm6 = vcmask 1044484  }
  0x79   : > { %2607 = vmatprep.subr.mxu1 %v3034_v8  ;;  %v2524_v44 = vld [vmem:[%s3810_s6] ss:$0 sm:$0xff]  ;;  %s3046_s2 = smov 104   ;;  %p607_p4 = scmp.lt.s32.totalorder %s3160_s25, 1  ;;  %vm911_vm7 = vcmask 1045509   ;;  %vm913_vm8 = vcmask 1046534  }
  0x7a   : > { %2608 = vmatpush3.msra.mxu1 %v652_v11  ;;  %v743_v45 = vsub.s32 %v740_v42, %v742_v30  ;;  %vm915_vm9 = vcmask 1047559   ;;  %vm2025_vm10 = vcmask 130048   ;;  %vm2027_vm11 = vcmask 195584   ;;  %p3863_p12 = scmp.ne.s32.totalorder %s3854_s28, 0 }
  0x7b   : > { %2612 = vmatprep.subr.mxu1 %v3034_v8  ;;  %1093 = vrot.lane.b32.xlu1 %v3322_v14, %s3036_s18  ;;  %s608_s7 = scalar_select %p607_p4, %s3160_s25, 1  ;;  %vm2251_vm12 = vcmask 523264  }
  0x7d   : > { %s2559_s11 = sshll.u32 %s608_s7, 5 }
  0x7f   : > { %1097 = vrot.lane.b32.xlu1 %v3330_v16, %s3036_s18 }
  0x83   : > { %1101 = vrot.lane.b32.xlu1 %v3336_v17, %s3036_s18 }
  0x87   : > { %1400 = vrot.lane.b32.xlu1 %v3322_v14, %s3037_s26 }
  0x8b   : > { %1402 = vrot.lane.b32.xlu1 %v3316_v13, %s3037_s26 }
  0x8f   : > { %1404 = vrot.lane.b32.xlu1 %v3330_v16, %s3037_s26 }
  0x93   : > { %1408 = vrot.lane.b32.xlu1 %v3336_v17, %s3037_s26 }
  0x97   : > { %1707 = vrot.lane.b32.xlu1 %v3322_v14, %s3038_s19 }
  0x9b   : > { %1709 = vrot.lane.b32.xlu1 %v3316_v13, %s3038_s19 }
  0x9f   : > { %1711 = vrot.lane.b32.xlu1 %v3330_v16, %s3038_s19 }
  0xa3   : > { %1715 = vrot.lane.b32.xlu1 %v3336_v17, %s3038_s19 }
  0xa7   : > { %1719 = vrot.lane.b32.xlu1 %v3344_v19, %s3038_s19 }
  0xe9   : > { %v1092_v36 = vpop.permute.xlu1 %1091 }
  0xed   : > { %v1094_v40 = vpop.permute.xlu1 %1093 }
  0xf1   : > { %v3398_v43 = vpop.permute.xlu1 %1097 }
  0xf5   : > { %v3411_v52 = vpop.permute.xlu1 %1101 }
  0xf9   : > { %v1401_v1 = vpop.permute.xlu1 %1400 }
  0xfd   : > { %v626_v2 = vpop.xlane.xlu0 %625 }
  0xfe   : > { %v628_v3 = vmul.f32 0.03125, %v626_v2 }
 0x100   : > { %v3287_v4 = vsub.f32 %v612_v0, %v628_v3 }
 0x102   : > { %v630_v5 = vmul.f32 %v3287_v4, %v3287_v4 }
 0x104   : > { %v631_v6 = vsel %vm623_vm0, %v630_v5, 0.0 }
 0x105   : > { %632 = vadd.xlane.f32.xlu0 %v631_v6 }
 0x11b   : > { %1095 = vrot.lane.b32.xlu0 %v3316_v13, %s3036_s18 }
 0x11f   : > { %1099 = vrot.lane.b32.xlu0 %v3324_v15, %s3036_s18 }
 0x123   : > { %1398 = vrot.lane.b32.xlu0 %v3314_v12, %s3037_s26 }
 0x127   : > { %1103 = vrot.lane.b32.xlu0 %v3338_v18, %s3036_s18 }
 0x12b   : > { %1105 = vrot.lane.b32.xlu0 %v3344_v19, %s3036_s18 }
 0x12f   : > { %1406 = vrot.lane.b32.xlu0 %v3324_v15, %s3037_s26 }
 0x133   : > { %1705 = vrot.lane.b32.xlu0 %v3314_v12, %s3038_s19 }
 0x137   : > { %1410 = vrot.lane.b32.xlu0 %v3338_v18, %s3037_s26 }
 0x13b   : > { %1412 = vrot.lane.b32.xlu0 %v3344_v19, %s3037_s26 }
 0x13f   : > { %1713 = vrot.lane.b32.xlu0 %v3324_v15, %s3038_s19 }
 0x143   : > { %1717 = vrot.lane.b32.xlu0 %v3338_v18, %s3038_s19 }
 0x18e   : > { %v633_v20 = vpop.xlane.xlu0 %632 }
 0x18f   : > { %v634_v21 = vmul.f32 0.03125, %v633_v20 }
 0x191   : > { %v635_v22 = vadd.f32 1e-12, %v634_v21  ;;  %v1403_v21 = vpop.permute.xlu1 %1402 }
 0x192   : > { %v3390_v33 = vpop.permute.xlu0 %1095 }
 0x193   : > { %2795 = vrsqrt.f32 %v635_v22 }
 0x196   : > { %v3392_v34 = vpop.permute.xlu0 %1099 }
 0x19a   : > { %v1399_v35 = vpop.permute.xlu0 %1398 }
 0x19e   : > { %v3394_v37 = vpop.permute.xlu0 %1103 }
 0x1a0   : > { %v2796_v23 = vpop.eup %2795 }
 0x1a1   : > { %v637_v25 = vmul.f32 %v2796_v23, %v3287_v4 }
 0x1a2   : > { %v3396_v41 = vpop.permute.xlu0 %1105 }
 0x1a3   : > { %v644_v27 = vmul.f32 %v2522_v24, %v637_v25  ;;  %v1405_v25 = vpop.permute.xlu1 %1404 }
 0x1a5   : > { %v651_v28 = vadd.f32 %v2523_v26, %v644_v27 }
 0x1a6   : > { %v1407_v46 = vpop.permute.xlu0 %1406 }
 0x1a7   : > { %2610 = vmatmul.mubr.msk.f32.vlgmr.msra.gmra.mxu1 %vm623_vm0, %v651_v28  ;;  %v1409_v28 = vpop.permute.xlu1 %1408 }
 0x1a8   : > { %2614 = vmatprep.mubr.msk.f32.mxu1 %vm3035_vm1, %v3034_v8 }
 0x1aa   : > { %v1706_v57 = vpop.permute.xlu0 %1705 }
 0x1ae   : > { %v1411_v7 = vpop.permute.xlu0 %1410 }
 0x267   : > { %v732_v47 = vpop.f32.mrf.mxu1 }
 0x268   : > { %v3403_v48 = vadd.f32 %v2524_v44, %v732_v47  ;;  %v3445_v47 = vpop.permute.xlu0 %1412 }
 0x269   : > { %v2611_v49 = vpop.f32.mrf.mxu1 }
 0x26a   : > { %v737_v50 = vcombine.high %v3403_v48, %v3403_v48  ;;  %v744_v51 = vrot.slane %v3403_v48, %v743_v45  ;;  %1179 = vrot.lane.b32.xlu0 %v3403_v48, %s3040_s29  ;;  %859 = vrot.lane.b32.xlu1 %v3403_v48, %s3041_s17  ;;  %s3566_s17 = scalar_lea.vmem %s3805_s1, %s2559_s11 }
 0x26c   : > { %v751_v54 = vrot.slane %v737_v50, %v743_v45  ;;  %v760_v55 = vrot.slane %v744_v51, %v743_v45  ;;  %v752_v56 = vcombine.high %v744_v51, %v744_v51  ;;  %v1714_v50 = vpop.permute.xlu0 %1713 }
 0x26e   : > { %v767_v58 = vrot.slane %v751_v54, %v743_v45  ;;  %v753_v59 = vcombine.high %v751_v54, %v751_v54  ;;  %v774_v60 = vrot.slane %v752_v56, %v743_v45  ;;  %1181 = vrot.lane.b32.xlu1 %v3403_v48, %s3042_s15  ;;  %v789_v61 = vrot.slane %v760_v55, %v788_v53  ;;  %s3047_s15 = smov 64  }
 0x26f   : > { %v782_v26 = vcombine.high %v760_v55, %v760_v55 }
 0x270   : > { %v783_v62 = vcombine.high %v767_v58, %v767_v58  ;;  %v781_v63 = vrot.slane %v753_v59, %v743_v45  ;;  %v784_v0 = vcombine.high %v774_v60, %v774_v60  ;;  %v805_v2 = vrot.slane %v767_v58, %v788_v53 }
 0x271   : > { %v1115_v3 = vmul.f32 %v1092_v36, %v789_v61  ;;  %v1422_v20 = vmul.f32 %v1399_v35, %v789_v61  ;;  %v1729_v23 = vmul.f32 %v1706_v57, %v789_v61  ;;  %v793_v24 = vrot.slane %v774_v60, %v788_v53  ;;  %v1708_v35 = vpop.permute.xlu1 %1707  ;;  %v1718_v60 = vpop.permute.xlu0 %1717 }
 0x272   : > { %v3414_v4 = vrot.slane %v783_v62, %v788_v53  ;;  %v785_v5 = vcombine.high %v781_v63, %v781_v63  ;;  %v3416_v6 = vrot.slane %v784_v0, %v788_v53  ;;  %1488 = vrot.lane.b32.xlu1 %v3403_v48, %s3043_s30  ;;  %v3419_v9 = vrot.slane %v781_v63, %v788_v53  ;;  %s3048_s30 = smov 48  }
 0x273   : > { %1131 = vrot.lane.b32.xlu0 %v1115_v3, %s3040_s29  ;;  %v1426_v22 = vmul.f32 %v1407_v46, %v805_v2  ;;  %v1116_v27 = vmul.f32 %v1094_v40, %v793_v24  ;;  %v797_v29 = vrot.slane %v782_v26, %v788_v53  ;;  %v1423_v30 = vmul.f32 %v1401_v1, %v793_v24 }
 0x274   : > { %v3423_v10 = vmul.f32 %v1411_v7, %v3414_v4  ;;  %v3425_v11 = vrot.slane %v785_v5, %v788_v53  ;;  %v1730_v36 = vmul.f32 %v1708_v35, %v793_v24  ;;  %v826_v40 = vmul.f32 %v789_v61, %v3314_v12 }
 0x275   : > { %v1424_v31 = vmul.f32 %v1403_v21, %v797_v29  ;;  %v1710_v38 = vpop.permute.xlu1 %1709  ;;  %v1117_v44 = vmul.f32 %v3390_v33, %v797_v29  ;;  %v827_v45 = vmul.f32 %v793_v24, %v3322_v14  ;;  %v1119_v46 = vmul.f32 %v3392_v34, %v805_v2 }
 0x276   : > { %1486 = vrot.lane.b32.xlu1 %v3403_v48, %s3044_s21  ;;  %v1731_v39 = vmul.f32 %v1710_v38, %v797_v29  ;;  %v835_v42 = vsel %vm834_vm2, %v826_v40, 0.0  ;;  %v830_v12 = vmul.f32 %v805_v2, %v3324_v15  ;;  %v1733_v51 = vmul.f32 %v1714_v50, %v805_v2 }
 0x277   : > { %1438 = vrot.lane.b32.xlu0 %v1422_v20, %s3044_s21  ;;  %v838_v49 = vsel %vm834_vm2, %v827_v45, 0.0  ;;  %v1118_v14 = vmul.f32 %v3398_v43, %v3416_v6  ;;  %v1120_v53 = vmul.f32 %v3411_v52, %v3419_v9  ;;  %v1425_v15 = vmul.f32 %v1405_v25, %v3416_v6 }
 0x278   : > { %v847_v33 = vsel %vm834_vm2, %v830_v12, 0.0  ;;  %v1427_v55 = vmul.f32 %v1409_v28, %v3419_v9  ;;  %v828_v56 = vmul.f32 %v797_v29, %v3316_v13  ;;  %v1121_v1 = vmul.f32 %v3394_v37, %v3414_v4 }
 0x279   : > { %v1712_v34 = vpop.permute.xlu1 %1711  ;;  %v1735_v3 = vmul.f32 %v1718_v60, %v3414_v4  ;;  %v832_v5 = vmul.f32 %v3414_v4, %v3338_v18  ;;  %v829_v20 = vmul.f32 %v3416_v6, %v3330_v16  ;;  %v1122_v16 = vmul.f32 %v3396_v41, %v3425_v11 }
 0x27a   : > { %1795 = vrot.lane.b32.xlu1 %v3403_v48, %s3045_s14  ;;  %v1732_v57 = vmul.f32 %v1712_v34, %v3416_v6  ;;  %v841_v58 = vsel %vm834_vm2, %v828_v56, 0.0  ;;  %v833_v6 = vmul.f32 %v3425_v11, %v3344_v19  ;;  %s3050_s14 = smov 56  }
 0x27b   : > { %1745 = vrot.lane.b32.xlu0 %v1729_v23, %s3046_s2  ;;  %v853_v37 = vsel %vm834_vm2, %v832_v5, 0.0  ;;  %v844_v21 = vsel %vm834_vm2, %v829_v20, 0.0 }
 0x27c   : > { %v856_v28 = vsel %vm834_vm2, %v833_v6, 0.0 }
 0x27d   : > { %v1716_v54 = vpop.permute.xlu1 %1715 }
 0x27e   : > { %1793 = vrot.lane.b32.xlu1 %v3403_v48, %s3046_s2  ;;  %v1734_v59 = vmul.f32 %v1716_v54, %v3419_v9 }
 0x281   : > { %v1720_v43 = vpop.permute.xlu1 %1719 }
 0x282   : > { %1133 = vrot.lane.b32.xlu1 %v1116_v27, %s3040_s29  ;;  %v1736_v7 = vmul.f32 %v1720_v43, %v3425_v11 }
 0x286   : > { %1440 = vrot.lane.b32.xlu1 %v1423_v30, %s3044_s21 }
 0x28a   : > { %1442 = vrot.lane.b32.xlu1 %v1424_v31, %s3044_s21 }
 0x28e   : > { %1747 = vrot.lane.b32.xlu1 %v1730_v36, %s3046_s2 }
 0x292   : > { %1749 = vrot.lane.b32.xlu1 %v1731_v39, %s3046_s2 }
 0x29a   : > { %836 = vadd.xlane.f32.xlu0 %v835_v42 }
 0x2b0   : > { %1135 = vrot.lane.b32.xlu0 %v1117_v44, %s3040_s29 }
 0x2b4   : > { %1139 = vrot.lane.b32.xlu0 %v1119_v46, %s3040_s29 }
 0x2b6   : > { %839 = vadd.xlane.f32.xlu1 %v838_v49 }
 0x2b8   : > { %1446 = vrot.lane.b32.xlu0 %v1426_v22, %s3044_s21 }
 0x2ba   : > { %848 = vadd.xlane.f32.xlu1 %v847_v33 }
 0x2bc   : > { %1753 = vrot.lane.b32.xlu0 %v1733_v51, %s3046_s2 }
 0x2cb   : > { %1137 = vrot.lane.b32.xlu1 %v1118_v14, %s3040_s29 }
 0x2cf   : > { %1141 = vrot.lane.b32.xlu1 %v1120_v53, %s3040_s29 }
 0x2d3   : > { %1444 = vrot.lane.b32.xlu1 %v1425_v15, %s3044_s21 }
 0x2d7   : > { %1448 = vrot.lane.b32.xlu1 %v1427_v55, %s3044_s21 }
 0x2db   : > { %842 = vadd.xlane.f32.xlu0 %v841_v58  ;;  %1751 = vrot.lane.b32.xlu1 %v1732_v57, %s3046_s2 }
 0x2dc   : > { %v860_v52 = vpop.permute.xlu1 %859  ;;  %v1180_v61 = vpop.permute.xlu0 %1179 }
 0x2dd   : > { %2613 = vmatpush3.xpose.msk.msra.mxu1 %vm834_vm2, %v860_v52 }
 0x2de   : > { %2617 = vmatprep.subr.mxu1 %v3034_v8 }
 0x2df   : > { %1755 = vrot.lane.b32.xlu1 %v1734_v59, %s3046_s2 }
 0x2e0   : > { %2615 = vmatmul.mubr.msk.f32.vlgmr.msra.gmra.mxu1 %vm834_vm2, %v3403_v48  ;;  %v1182_v13 = vpop.permute.xlu1 %1181 }
 0x2e1   : > { %2623 = vmatpush3.xpose.msk.msra.mxu0 %vm834_vm2, %v1182_v13  ;;  %2619 = vmatprep.mubr.msk.f32.mxu1 %vm3035_vm1, %v3034_v8 }
 0x2e2   : > { %2632 = vmatprep.subr.mxu0 %v3034_v8 }
 0x2e4   : > { %v1489_v62 = vpop.permute.xlu1 %1488  ;;  %2625 = vmatmul.mubr.msk.f32.vlgmr.msra.gmra.mxu0 %vm834_vm2, %v1180_v61 }
 0x2e5   : > { %2633 = vmatpush3.xpose.msk.msra.mxu0 %vm834_vm2, %v1489_v62  ;;  %2634 = vmatprep.mubr.msk.f32.mxu0 %vm3035_vm1, %v3034_v8  ;;  %v1132_v4 = vpop.permute.xlu0 %1131 }
 0x2e6   : > { %2642 = vmatprep.subr.mxu0 %v3034_v8  ;;  %v1155_v31 = vsel %vm834_vm2, %v1132_v4, 0.0 }
 0x2e8   : > { %v1487_v63 = vpop.permute.xlu1 %1486 }
 0x2e9   : > { %2635 = vmatmul.mubr.msk.f32.vlgmr.msra.gmra.mxu0 %vm834_vm2, %v1487_v63  ;;  %v1439_v24 = vpop.permute.xlu0 %1438 }
 0x2ea   : > { %2644 = vmatprep.mubr.msk.f32.mxu0 %vm3035_vm1, %v3034_v8  ;;  %v1462_v35 = vsel %vm834_vm2, %v1439_v24, 0.0 }
 0x2ec   : > { %v1796_v0 = vpop.permute.xlu1 %1795 }
 0x2ed   : > { %2643 = vmatpush3.xpose.msk.msra.mxu0 %vm834_vm2, %v1796_v0  ;;  %v1746_v26 = vpop.permute.xlu0 %1745 }
 0x2ee   : > { %2652 = vmatprep.subr.mxu0 %v3034_v8  ;;  %v1769_v39 = vsel %vm834_vm2, %v1746_v26, 0.0 }
 0x2f0   : > { %v1794_v2 = vpop.permute.xlu1 %1793 }
 0x2f1   : > { %1143 = vrot.lane.b32.xlu0 %v1121_v1, %s3040_s29  ;;  %2645 = vmatmul.mubr.msk.f32.vlgmr.msra.gmra.mxu0 %vm834_vm2, %v1794_v2 }
 0x2f2   : > { %2660 = vmatprep.mubr.msk.f32.mxu0 %vm3035_vm1, %v3034_v8 }
 0x2f4   : > { %v1134_v18 = vpop.permute.xlu1 %1133 }
 0x2f5   : > { %1450 = vrot.lane.b32.xlu0 %v3423_v10, %s3044_s21  ;;  %v831_v10 = vmul.f32 %v3419_v9, %v3336_v17  ;;  %v1429_v17 = vmul.f32 %v3445_v47, %v3425_v11  ;;  %v1158_v47 = vsel %vm834_vm2, %v1134_v18, 0.0 }
 0x2f7   : > { %v850_v22 = vsel %vm834_vm2, %v831_v10, 0.0 }
 0x2f8   : > { %v1441_v23 = vpop.permute.xlu1 %1440 }
 0x2f9   : > { %1757 = vrot.lane.b32.xlu0 %v1735_v3, %s3046_s2  ;;  %v1465_v50 = vsel %vm834_vm2, %v1441_v23, 0.0 }
 0x2fc   : > { %v1443_v25 = vpop.permute.xlu1 %1442 }
 0x2fd   : > { %v1468_v51 = vsel %vm834_vm2, %v1443_v25, 0.0 }
 0x300   : > { %v1748_v27 = vpop.permute.xlu1 %1747 }
 0x301   : > { %v1772_v34 = vsel %vm834_vm2, %v1748_v27, 0.0 }
 0x303   : > { %854 = vadd.xlane.f32.xlu1 %v853_v37 }
 0x304   : > { %v1750_v30 = vpop.permute.xlu1 %1749 }
 0x305   : > { %v1775_v56 = vsel %vm834_vm2, %v1750_v30, 0.0 }
 0x314   : > { %1759 = vrot.lane.b32.xlu1 %v1736_v7, %s3046_s2  ;;  %s2519_s2 = sshll.u32 %s3265_s23, 5 }
 0x315   : > { %s3639_s7 = scalar_lea.vmem [#allocation11], %s2519_s2 }
 0x316   : > { %s2359_s11 = sshll.u32 %s3639_s7, 4  ;;  %s3736_s11 = int_to_ptr.vmem [resolvable:$true] %s2359_s11 }
 0x318   : > { %845 = vadd.xlane.f32.xlu0 %v844_v21 }
 0x31c   : > { %851 = vadd.xlane.f32.xlu0 %v850_v22 }
 0x323   : > { %v837_v9 = vpop.xlane.xlu0 %836 }
 0x324   : > { %v874_v19 = vrot.slane %v837_v9, %v3388_v32 }
 0x327   : > { %v1136_v29 = vpop.permute.xlu0 %1135 }
 0x328   : > { %v1161_v49 = vsel %vm834_vm2, %v1136_v29, 0.0 }
 0x32b   : > { %v1140_v36 = vpop.permute.xlu0 %1139 }
 0x32c   : > { %v1167_v42 = vsel %vm834_vm2, %v1140_v36, 0.0 }
 0x32f   : > { %v1447_v40 = vpop.permute.xlu0 %1446 }
 0x330   : > { %v1474_v44 = vsel %vm834_vm2, %v1447_v40, 0.0 }
 0x332   : > { %1145 = vrot.lane.b32.xlu0 %v1122_v16, %s3040_s29  ;;  %s2333_s29 = scalar_lea.sflag [#allocation12], %s3265_s23 }
 0x333   : > { %v1754_v45 = vpop.permute.xlu0 %1753 }
 0x334   : > { %v1781_v46 = vsel %vm834_vm2, %v1754_v45, 0.0 }
 0x336   : > { %1452 = vrot.lane.b32.xlu0 %v1429_v17, %s3044_s21  ;;  %s3049_s21 = smov 40  }
 0x338   : > { %857 = vadd.xlane.f32.xlu1 %v856_v28 }
 0x33c   : > { %1156 = vadd.xlane.f32.xlu1 %v1155_v31 }
 0x33f   : > { %v840_v41 = vpop.xlane.xlu1 %839 }
 0x340   : > { %v878_v11 = vrot.slane %v840_v41, %v3388_v32  ;;  %1463 = vadd.xlane.f32.xlu1 %v1462_v35 }
 0x342   : > { %v904_v38 = vsel %vm903_vm3, %v878_v11, %v874_v19 }
 0x343   : > { %v849_v12 = vpop.xlane.xlu1 %848 }
 0x344   : > { %1770 = vadd.xlane.f32.xlu1 %v1769_v39  ;;  %v890_v18 = vrot.slane %v849_v12, %v3388_v32 }
 0x347   : > { %v1138_v33 = vpop.permute.xlu1 %1137 }
 0x348   : > { %1168 = vadd.xlane.f32.xlu1 %v1167_v42  ;;  %v1164_v52 = vsel %vm834_vm2, %v1138_v33, 0.0  ;;  %v993_v42 = vld [vmem:[%s3566_s17] sm:$0xff] }
 0x34b   : > { %v1142_v53 = vpop.permute.xlu1 %1141 }
 0x34c   : > { %1475 = vadd.xlane.f32.xlu1 %v1474_v44  ;;  %v1170_v60 = vsel %vm834_vm2, %v1142_v53, 0.0 }
 0x34f   : > { %v1445_v57 = vpop.permute.xlu1 %1444 }
 0x350   : > { %1782 = vadd.xlane.f32.xlu1 %v1781_v46  ;;  %v1471_v61 = vsel %vm834_vm2, %v1445_v57, 0.0 }
 0x353   : > { %v1449_v13 = vpop.permute.xlu1 %1448 }
 0x354   : > { %v1477_v63 = vsel %vm834_vm2, %v1449_v13, 0.0 }
 0x355   : > { %1159 = vadd.xlane.f32.xlu0 %v1158_v47 }
 0x357   : > { %v1752_v62 = vpop.permute.xlu1 %1751 }
 0x358   : > { %v1778_v0 = vsel %vm834_vm2, %v1752_v62, 0.0 }
 0x359   : > { %1162 = vadd.xlane.f32.xlu0 %v1161_v49 }
 0x35b   : > { %v1756_v1 = vpop.permute.xlu1 %1755 }
 0x35c   : > { %v1784_v2 = vsel %vm834_vm2, %v1756_v1, 0.0 }
 0x35d   : > { %1466 = vadd.xlane.f32.xlu0 %v1465_v50 }
 0x361   : > { %1469 = vadd.xlane.f32.xlu0 %v1468_v51 }
 0x364   : > { %v843_v14 = vpop.xlane.xlu0 %842 }
 0x365   : > { %v882_v15 = vrot.slane %v843_v14, %v3388_v32  ;;  %1773 = vadd.xlane.f32.xlu0 %v1772_v34 }
 0x367   : > { %v906_v54 = vsel %vm905_vm4, %v882_v15, %v904_v38 }
 0x368   : > { %v1144_v55 = vpop.permute.xlu0 %1143 }
 0x369   : > { %1776 = vadd.xlane.f32.xlu0 %v1775_v56  ;;  %v1173_v43 = vsel %vm834_vm2, %v1144_v55, 0.0 }
 0x36a   : > { %1174 = vadd.xlane.f32.xlu1 %v1173_v43 }
 0x36c   : > { %v1451_v58 = vpop.permute.xlu0 %1450 }
 0x36d   : > { %1165 = vadd.xlane.f32.xlu0 %v1164_v52  ;;  %v1480_v59 = vsel %vm834_vm2, %v1451_v58, 0.0 }
 0x36e   : > { %1481 = vadd.xlane.f32.xlu1 %v1480_v59 }
 0x370   : > { %v1758_v7 = vpop.permute.xlu0 %1757 }
 0x371   : > { %1171 = vadd.xlane.f32.xlu0 %v1170_v60  ;;  %v1787_v30 = vsel %vm834_vm2, %v1758_v7, 0.0 }
 0x375   : > { %1472 = vadd.xlane.f32.xlu0 %v1471_v61 }
 0x379   : > { %1478 = vadd.xlane.f32.xlu0 %v1477_v63 }
 0x37d   : > { %1779 = vadd.xlane.f32.xlu0 %v1778_v0 }
 0x381   : > { %1785 = vadd.xlane.f32.xlu0 %v1784_v2 }
 0x38c   : > { %v855_v3 = vpop.xlane.xlu1 %854 }
 0x38d   : > { %v898_v19 = vrot.slane %v855_v3, %v3388_v32 }
 0x390   : > { %v1760_v5 = vpop.permute.xlu1 %1759 }
 0x391   : > { %v1790_v37 = vsel %vm834_vm2, %v1760_v5, 0.0 }
 0x392   : > { %1791 = vadd.xlane.f32.xlu0 %v1790_v37 }
 0x3a0   : > { %v988_v20 = vpop.f32.mrf.mxu1 }
 0x3a1   : > { %v846_v21 = vpop.xlane.xlu0 %845 }
 0x3a2   : > { %v886_v10 = vrot.slane %v846_v21, %v3388_v32  ;;  %v2616_v22 = vpop.f32.mrf.mxu1 }
 0x3a4   : > { %v908_v4 = vsel %vm907_vm5, %v886_v10, %v906_v54  ;;  %v3546_v23 = vpop.f32.mrf.mxu0 }
 0x3a5   : > { %v910_v24 = vsel %vm909_vm6, %v890_v18, %v908_v4  ;;  %v852_v25 = vpop.xlane.xlu0 %851 }
 0x3a6   : > { %v2626_v26 = vpop.f32.mrf.mxu0  ;;  %v894_v41 = vrot.slane %v852_v25, %v3388_v32 }
 0x3a8   : > { %v912_v35 = vsel %vm911_vm7, %v894_v41, %v910_v24 }
 0x3a9   : > { %v1146_v16 = vpop.permute.xlu0 %1145  ;;  %v3549_v6 = vpop.f32.mrf.mxu0  ;;  %v914_v38 = vsel %vm913_vm8, %v898_v19, %v912_v35 }
 0x3aa   : > { %v1176_v17 = vsel %vm834_vm2, %v1146_v16, 0.0 }
 0x3ab   : > { %1177 = vadd.xlane.f32.xlu1 %v1176_v17  ;;  %v2636_v9 = vpop.f32.mrf.mxu0 }
 0x3ad   : > { %v1453_v27 = vpop.permute.xlu0 %1452 }
 0x3ae   : > { %v1483_v28 = vsel %vm834_vm2, %v1453_v27, 0.0 }
 0x3af   : > { %1484 = vadd.xlane.f32.xlu1 %v1483_v28 }
 0x3b1   : > { %v3553_v29 = vpop.f32.mrf.mxu0 }
 0x3b3   : > { %1788 = vadd.xlane.f32.xlu1 %v1787_v30  ;;  %v2646_v31 = vpop.f32.mrf.mxu0 }
 0x3c1   : > { %v858_v36 = vpop.xlane.xlu1 %857 }
 0x3c2   : > { %v902_v11 = vrot.slane %v858_v36, %v3388_v32 }
 0x3c4   : > { %v916_v39 = vsel %vm915_vm9, %v902_v11, %v914_v38 }
 0x3c5   : > { %v989_v40 = vadd.f32 %v988_v20, %v916_v39  ;;  %v1157_v33 = vpop.xlane.xlu1 %1156 }
 0x3c6   : > { %v1194_v60 = vrot.slane %v1157_v33, %v3388_v32 }
 0x3c7   : > { %v992_v44 = vmul.f32 0.35355338, %v989_v40 }
 0x3c9   : > { %v3570_v45 = vadd.f32 %v993_v42, %v992_v44  ;;  %v1464_v14 = vpop.xlane.xlu1 %1463 }
 0x3ca   : > { %v1501_v2 = vrot.slane %v1464_v14, %v3388_v32 }
 0x3cb   : > { %v995_v46 = vsel %vm834_vm2, %v3570_v45, -inf }
 0x3cc   : > { %996 = vmax.xlane.f32.xlu1 %v995_v46 }
 0x3cd   : > { %v1771_v53 = vpop.xlane.xlu1 %1770 }
 0x3ce   : > { %v1808_v30 = vrot.slane %v1771_v53, %v3388_v32 }
 0x3d1   : > { %v1169_v54 = vpop.xlane.xlu1 %1168 }
 0x3d2   : > { %v1210_v7 = vrot.slane %v1169_v54, %v3388_v32 }
 0x3d5   : > { %v1476_v56 = vpop.xlane.xlu1 %1475 }
 0x3d6   : > { %v1517_v26 = vrot.slane %v1476_v56, %v3388_v32  ;;  %v2536_v56 = vld [vmem:[%s3566_s17 + $0x10] sm:$0xff] }
 0x3d9   : > { %v1783_v57 = vpop.xlane.xlu1 %1782 }
 0x3de   : > { %v1160_v47 = vpop.xlane.xlu0 %1159 }
 0x3df   : > { %v1198_v58 = vrot.slane %v1160_v47, %v3388_v32  ;;  %v2531_v47 = vld [vmem:[%s3566_s17 + $0x8] sm:$0xff] }
 0x3e1   : > { %v1223_v62 = vsel %vm903_vm3, %v1198_v58, %v1194_v60 }
 0x3e2   : > { %v1163_v49 = vpop.xlane.xlu0 %1162 }
 0x3e3   : > { %v1202_v52 = vrot.slane %v1163_v49, %v3388_v32 }
 0x3e5   : > { %v1224_v0 = vsel %vm905_vm4, %v1202_v52, %v1223_v62  ;;  %v2541_v62 = vld [vmem:[%s3566_s17 + $0x18] sm:$0xff]  ;;  %s2924_s17 = scalar_lea.vmem %s3736_s11, 512 }
 0x3e6   : > { %v1467_v12 = vpop.xlane.xlu0 %1466  ;;  %p2925_p6 = scmp.ne.s32.totalorder %s3736_s11, %s2924_s17 }
 0x3e7   : > { %v1505_v63 = vrot.slane %v1467_v12, %v3388_v32 }
 0x3e8   : > { %p2926_p0 = pnand %p2925_p6, %p3863_p12 }
 0x3e9   : > { %v1530_v21 = vsel %vm903_vm3, %v1505_v63, %v1501_v2 }
 0x3ea   : > { %v1470_v50 = vpop.xlane.xlu0 %1469  ;;  %p2927_p5 = pneg %p2926_p0 }
 0x3eb   : > { %v1509_v1 = vrot.slane %v1470_v50, %v3388_v32 }
 0x3ed   : > { %v1531_v22 = vsel %vm905_vm4, %v1509_v1, %v1530_v21 }
 0x3ee   : > { %v1774_v51 = vpop.xlane.xlu0 %1773 }
 0x3ef   : > { %v1812_v16 = vrot.slane %v1774_v51, %v3388_v32  ;;  %v1824_v51 = vrot.slane %v1783_v57, %v3388_v32 }
 0x3f1   : > { %v1837_v38 = vsel %vm903_vm3, %v1812_v16, %v1808_v30 }
 0x3f2   : > { %v1777_v34 = vpop.xlane.xlu0 %1776 }
 0x3f3   : > { %v1175_v59 = vpop.xlane.xlu1 %1174  ;;  %v1816_v27 = vrot.slane %v1777_v34, %v3388_v32 }
 0x3f4   : > { %v1218_v17 = vrot.slane %v1175_v59, %v3388_v32 }
 0x3f5   : > { %v1838_v44 = vsel %vm905_vm4, %v1816_v27, %v1837_v38 }
 0x3f6   : > { %v1166_v15 = vpop.xlane.xlu0 %1165 }
 0x3f7   : > { %v1206_v13 = vrot.slane %v1166_v15, %v3388_v32  ;;  %v1482_v20 = vpop.xlane.xlu1 %1481 }
 0x3f8   : > { %v1525_v39 = vrot.slane %v1482_v20, %v3388_v32 }
 0x3f9   : > { %v1225_v3 = vsel %vm907_vm5, %v1206_v13, %v1224_v0 }
 0x3fa   : > { %v1172_v55 = vpop.xlane.xlu0 %1171  ;;  %v1226_v18 = vsel %vm909_vm6, %v1210_v7, %v1225_v3 }
 0x3fb   : > { %v1214_v5 = vrot.slane %v1172_v55, %v3388_v32 }
 0x3fd   : > { %v1227_v4 = vsel %vm911_vm7, %v1214_v5, %v1226_v18 }
 0x3fe   : > { %v1473_v43 = vpop.xlane.xlu0 %1472  ;;  %v1228_v35 = vsel %vm913_vm8, %v1218_v17, %v1227_v4 }
 0x3ff   : > { %v1513_v37 = vrot.slane %v1473_v43, %v3388_v32 }
 0x401   : > { %v1532_v24 = vsel %vm907_vm5, %v1513_v37, %v1531_v22 }
 0x402   : > { %v1479_v61 = vpop.xlane.xlu0 %1478  ;;  %v1533_v31 = vsel %vm909_vm6, %v1517_v26, %v1532_v24 }
 0x403   : > { %v1521_v25 = vrot.slane %v1479_v61, %v3388_v32 }
 0x405   : > { %v1534_v19 = vsel %vm911_vm7, %v1521_v25, %v1533_v31 }
 0x406   : > { %v1780_v10 = vpop.xlane.xlu0 %1779  ;;  %v1535_v50 = vsel %vm913_vm8, %v1525_v39, %v1534_v19 }
 0x407   : > { %v1820_v41 = vrot.slane %v1780_v10, %v3388_v32 }
 0x409   : > { %v1839_v49 = vsel %vm907_vm5, %v1820_v41, %v1838_v44 }
 0x40a   : > { %v1786_v36 = vpop.xlane.xlu0 %1785  ;;  %v1840_v54 = vsel %vm909_vm6, %v1824_v51, %v1839_v49  ;;  %v2029_v51 = vld [vmem:[#allocation7] sm:$0xff] }
 0x40b   : > { %v1828_v12 = vrot.slane %v1786_v36, %v3388_v32 }
 0x40d   : > { %v1841_v43 = vsel %vm911_vm7, %v1828_v12, %v1840_v54  ;;  %v2032_v12 = vld [vmem:[#allocation7 + $0x18] sm:$0xff] }
 0x40e   : > { %2653 = vmatpush3.msra.mxu0 %v2032_v12 }
 0x40f   : > { %2654 = vmatprep.subr.mxu0 %v3034_v8 }
 0x41b   : > { %v1792_v14 = vpop.xlane.xlu0 %1791 }
 0x41c   : > { %v1836_v58 = vrot.slane %v1792_v14, %v3388_v32 }
 0x434   : > { %v1178_v9 = vpop.xlane.xlu1 %1177 }
 0x435   : > { %v1222_v28 = vrot.slane %v1178_v9, %v3388_v32 }
 0x437   : > { %v1229_v11 = vsel %vm915_vm9, %v1222_v28, %v1228_v35 }
 0x438   : > { %v1485_v40 = vpop.xlane.xlu1 %1484  ;;  %v1302_v42 = vadd.f32 %v3546_v23, %v1229_v11 }
 0x439   : > { %v1529_v46 = vrot.slane %v1485_v40, %v3388_v32 }
 0x43a   : > { %v1305_v33 = vmul.f32 0.35355338, %v1302_v42 }
 0x43b   : > { %v1536_v34 = vsel %vm915_vm9, %v1529_v46, %v1535_v50  ;;  %v2031_v50 = vld [vmem:[#allocation7 + $0x10] sm:$0xff] }
 0x43c   : > { %v1789_v53 = vpop.xlane.xlu1 %1788  ;;  %v1308_v23 = vadd.f32 %v2531_v47, %v1305_v33  ;;  %v1609_v15 = vadd.f32 %v3549_v6, %v1536_v34  ;;  %v2030_v33 = vld [vmem:[#allocation7 + $0x8] sm:$0xff]  ;;  %2655 = vmatpush3.msra.mxu0 %v2031_v50 }
 0x43d   : > { %v1832_v55 = vrot.slane %v1789_v53, %v3388_v32  ;;  %2656 = vmatprep.subr.mxu0 %v3034_v8 }
 0x43e   : > { %v1309_v52 = vsel %vm834_vm2, %v1308_v23, -inf  ;;  %v1612_v57 = vmul.f32 0.35355338, %v1609_v15  ;;  %2657 = vmatpush3.msra.mxu0 %v2030_v33 }
 0x43f   : > { %v1842_v59 = vsel %vm913_vm8, %v1832_v55, %v1841_v43  ;;  %1310 = vmax.xlane.f32.xlu0 %v1309_v52  ;;  %2658 = vmatprep.subr.mxu0 %v3034_v8 }
 0x440   : > { %v1615_v60 = vadd.f32 %v2536_v56, %v1612_v57  ;;  %v1843_v13 = vsel %vm915_vm9, %v1836_v58, %v1842_v59  ;;  %2659 = vmatpush3.msra.mxu0 %v2029_v51  ;;  %v2544_v59 = vld [vmem:[%s3812_s8] ss:$0 sm:$0xff] }
 0x441   : > { %v1916_v6 = vadd.f32 %v3553_v29, %v1843_v13  ;;  %2674 = vmatprep.subr.mxu0 %v3034_v8 }
 0x442   : > { %v1616_v61 = vsel %vm834_vm2, %v1615_v60, -inf }
 0x443   : > { %1617 = vmax.xlane.f32.xlu1 %v1616_v61  ;;  %v1919_v63 = vmul.f32 0.35355338, %v1916_v6  ;;  %v2817_v61 = vld [vmem:[%s3271_s24] sm:$0xff] }
 0x445   : > { %v1922_v0 = vadd.f32 %v2541_v62, %v1919_v63 }
 0x447   : > { %v1923_v1 = vsel %vm834_vm2, %v1922_v0, -inf }
 0x448   : > { %1924 = vmax.xlane.f32.xlu0 %v1923_v1 }
 0x454   : > { %1007 = vrot.lane.b32.xlu1 %v3403_v48, %s3047_s15  ;;  %s3051_s15 = smov [#allocation11]  }
 0x455   : > { %v997_v32 = vpop.xlane.xlu1 %996 }
 0x456   : > { %v998_v2 = vsub.f32 %v3570_v45, %v997_v32 }
 0x458   : > { %v999_v3 = vmul.f32 1.442695, %v998_v2 }
 0x45a   : > { %2797 = vpow2.f32 %v999_v3 }
 0x467   : > { %v2798_v5 = vpop.eup %2797 }
 0x468   : > { %v1001_v29 = vsel %vm834_vm2, %v2798_v5, 0.0 }
 0x478   : > { %1002 = vadd.xlane.f32.xlu1 %v1001_v29  ;;  %v2145_v29 = vld [vmem:[#allocation8 + $0x10] sm:$0xff] }
 0x4c8   : > { %v1311_v37 = vpop.xlane.xlu0 %1310 }
 0x4c9   : > { %v1312_v7 = vsub.f32 %v1308_v23, %v1311_v37  ;;  %v2144_v37 = vld [vmem:[#allocation8 + $0x8] sm:$0xff] }
 0x4cb   : > { %v1313_v20 = vmul.f32 1.442695, %v1312_v7  ;;  %v2143_v7 = vld [vmem:[#allocation8] sm:$0xff] }
 0x4cc   : > { %v1618_v21 = vpop.xlane.xlu1 %1617 }
 0x4cd   : > { %2799 = vpow2.f32 %v1313_v20  ;;  %v1619_v10 = vsub.f32 %v1615_v60, %v1618_v21 }
 0x4cf   : > { %v1620_v22 = vmul.f32 1.442695, %v1619_v10 }
 0x4d0   : > { %v1008_v18 = vpop.permute.xlu1 %1007 }
 0x4d1   : > { %2801 = vpow2.f32 %v1620_v22  ;;  %2618 = vmatpush3.msra.mxu1 %v1008_v18  ;;  %v1925_v4 = vpop.xlane.xlu0 %1924  ;;  %v2546_v18 = vld [vmem:[%s3813_s9] ss:$0 sm:$0xff] }
 0x4d2   : > { %v1926_v24 = vsub.f32 %v1922_v0, %v1925_v4  ;;  %2627 = vmatprep.subr.mxu1 %v3034_v8 }
 0x4d4   : > { %v1927_v45 = vmul.f32 1.442695, %v1926_v24  ;;  %v2547_v24 = vld [vmem:[%s3814_s10] ss:$0 sm:$0xff] }
 0x4d6   : > { %2803 = vpow2.f32 %v1927_v45 }
 0x4da   : > { %v2800_v25 = vpop.eup %2799 }
 0x4db   : > { %v1315_v26 = vsel %vm834_vm2, %v2800_v25, 0.0 }
 0x4dc   : > { %1316 = vadd.xlane.f32.xlu0 %v1315_v26  ;;  %v2243_v26 = vld [vmem:[%s3817_s13 + $0x38] sm:$0xff] }
 0x4de   : > { %v2802_v16 = vpop.eup %2801 }
 0x4df   : > { %v1622_v17 = vsel %vm834_vm2, %v2802_v16, 0.0 }
 0x4e0   : > { %1623 = vadd.xlane.f32.xlu1 %v1622_v17  ;;  %v2241_v17 = vld [vmem:[%s3817_s13 + $0x28] sm:$0xff] }
 0x4e3   : > { %v2804_v9 = vpop.eup %2803 }
 0x4e4   : > { %v1929_v27 = vsel %vm834_vm2, %v2804_v9, 0.0 }
 0x4e5   : > { %1930 = vadd.xlane.f32.xlu0 %v1929_v27  ;;  %v2239_v27 = vld [vmem:[%s3817_s13 + $0x18] sm:$0xff] }
 0x4f1   : > { %1629 = vrot.lane.b32.xlu1 %v3403_v48, %s3048_s30  ;;  %s2928_s30 = sshll.u32 %s3051_s15, 4  ;;  %s2929_s30 = int_to_ptr.vmem [resolvable:$false] %s2928_s30 }
 0x4f2   : > { %p2931_p3 = scmp.lt.s32.totalorder %s3736_s11, %s2929_s30 }
 0x4f5   : > { %1936 = vrot.lane.b32.xlu1 %v3403_v48, %s3049_s21 }
 0x4fb   : > { %1322 = vrot.lane.b32.xlu0 %v3403_v48, %s3050_s14 }
 0x501   : > { %v1003_v28 = vpop.xlane.xlu1 %1002 }
 0x502   : > { %2805 = vrcp.f32 %v1003_v28  ;;  %v2238_v28 = vld [vmem:[%s3817_s13 + $0x10] sm:$0xff] }
 0x50f   : > { %v2806_v30 = vpop.eup %2805 }
 0x510   : > { %v1005_v31 = vmul.f32 %v2806_v30, %v2798_v5  ;;  %v2146_v5 = vld [vmem:[#allocation8 + $0x18] sm:$0xff] }
 0x511   : > { %v2237_v30 = vld [vmem:[%s3817_s13 + $0x8] sm:$0xff] }
 0x512   : > { %1006 = vst.msk [vmem:[%s3639_s7] sm:$0xff] %vm834_vm2, %v1005_v31  ;;  %2620 = vmatmul.mubr.msk.f32.vlgmr.msra.gmra.mxu1 %vm834_vm2, %v1005_v31  ;;  %v2236_v31 = vld [vmem:[%s3817_s13] sm:$0xff] }
 0x513   : > { %2629 = vmatprep.mubr.msk.f32.mxu1 %vm3035_vm1, %v3034_v8 }
 0x565   : > { %v1317_v41 = vpop.xlane.xlu0 %1316 }
 0x566   : > { %2807 = vrcp.f32 %v1317_v41  ;;  %v2548_v41 = vld [vmem:[%s3816_s12] ss:$0 sm:$0xff] }
 0x569   : > { %v1624_v35 = vpop.xlane.xlu1 %1623 }
 0x56a   : > { %2809 = vrcp.f32 %v1624_v35 }
 0x56d   : > { %v1630_v11 = vpop.permute.xlu1 %1629 }
 0x56e   : > { %v1931_v48 = vpop.xlane.xlu0 %1930 }
 0x56f   : > { %2811 = vrcp.f32 %v1931_v48 }
 0x571   : > { %v1937_v42 = vpop.permute.xlu1 %1936 }
 0x572   : > { %v1323_v19 = vpop.permute.xlu0 %1322 }
 0x573   : > { %v2808_v36 = vpop.eup %2807  ;;  %2628 = vmatpush3.msra.mxu1 %v1323_v19 }
 0x574   : > { %2637 = vmatprep.subr.mxu1 %v3034_v8  ;;  %v1319_v38 = vmul.f32 %v2808_v36, %v2800_v25 }
 0x576   : > { %2532 = vst.msk [vmem:[%s3639_s7 + $0x8] sm:$0xff] %vm834_vm2, %v1319_v38  ;;  %2630 = vmatmul.mubr.msk.f32.vlgmr.msra.gmra.mxu1 %vm834_vm2, %v1319_v38 }
 0x577   : > { %v2810_v39 = vpop.eup %2809  ;;  %2638 = vmatpush3.msra.mxu1 %v1630_v11  ;;  %2639 = vmatprep.mubr.msk.f32.mxu1 %vm3035_vm1, %v3034_v8 }
 0x578   : > { %2647 = vmatprep.subr.mxu1 %v3034_v8  ;;  %v1626_v40 = vmul.f32 %v2810_v39, %v2802_v16  ;;  %v2242_v16 = vld [vmem:[%s3817_s13 + $0x30] sm:$0xff] }
 0x57a   : > { %2537 = vst.msk [vmem:[%s3639_s7 + $0x10] sm:$0xff] %vm834_vm2, %v1626_v40  ;;  %2640 = vmatmul.mubr.msk.f32.vlgmr.msra.gmra.mxu1 %vm834_vm2, %v1626_v40 }
 0x57b   : > { %2648 = vmatpush3.msra.mxu1 %v1937_v42  ;;  %2649 = vmatprep.mubr.msk.f32.mxu1 %vm3035_vm1, %v3034_v8 }
 0x57c   : > { %v2812_v44 = vpop.eup %2811  ;;  %2663 = vmatprep.subr.mxu1 %v3034_v8 }
 0x57d   : > { %v1933_v46 = vmul.f32 %v2812_v44, %v2804_v9  ;;  %v2240_v9 = vld [vmem:[%s3817_s13 + $0x20] sm:$0xff] }
 0x57f   : > { %2542 = vst.msk [vmem:[%s3639_s7 + $0x18] sm:$0xff] %vm834_vm2, %v1933_v46  ;;  %2650 = vmatmul.mubr.msk.f32.vlgmr.msra.gmra.mxu1 %vm834_vm2, %v1933_v46  ;;  %s2930_s7 = scalar_lea.vmem %s2929_s30, 1024 }
 0x580   : > { %2671 = vmatprep.mubr.msk.f32.mxu1 %vm3035_vm1, %v3034_v8  ;;  %2664 = vmatpush3.msra.mxu1 %v2146_v5  ;;  %p2932_p7 = scmp.lt.s32.totalorder %s2930_s7, %s2924_s17 }
 0x581   : > { %2665 = vmatprep.subr.mxu1 %v3034_v8 }
 0x582   : > { %2666 = vmatpush3.msra.mxu1 %v2145_v29  ;;  %p2933_p9 = por %p2932_p7, %p2931_p3 }
 0x583   : > { %2667 = vmatprep.subr.mxu1 %v3034_v8 }
 0x584   : > { %2668 = vmatpush3.msra.mxu1 %v2144_v37  ;;  %p2934_p13 = pnand %p2933_p9, %p2927_p5 }
 0x585   : > { %2669 = vmatprep.subr.mxu1 %v3034_v8 }
 0x586   : > { %2670 = vmatpush3.msra.mxu1 %v2143_v7 }
 0x5d2   : > { %v1079_v47 = vpop.f32.mrf.mxu1 }
 0x5d4   : > { %v2621_v49 = vpop.f32.mrf.mxu1 }
 0x636   : > { %v1394_v14 = vpop.f32.mrf.mxu1 }
 0x637   : > { %2013 = vrot.lane.b32.xlu0 %v1394_v14, %s3036_s18 }
 0x638   : > { %v2631_v34 = vpop.f32.mrf.mxu1 }
 0x63a   : > { %v1701_v53 = vpop.f32.mrf.mxu1 }
 0x63b   : > { %2017 = vrot.lane.b32.xlu1 %v1701_v53, %s3037_s26  ;;  %s2560_s26 = sshll.u32 %s3160_s25, 9 }
 0x63c   : > { %v2641_v23 = vpop.f32.mrf.mxu1  ;;  %s3734_s27 = scalar_lea.hbm %s3820_s16, %s2560_s26 }
 0x63f   : > { %v2008_v15 = vpop.f32.mrf.mxu1 }
 0x640   : > { %2021 = vrot.lane.b32.xlu0 %v2008_v15, %s3038_s19 }
 0x641   : > { %v2651_v54 = vpop.f32.mrf.mxu1 }
 0x6a9   : > { %v2014_v55 = vpop.permute.xlu0 %2013 }
 0x6aa   : > { %v2024_v43 = vsel %vm834_vm2, %v1079_v47, %v2014_v55 }
 0x6ad   : > { %v2018_v56 = vpop.permute.xlu1 %2017 }
 0x6ae   : > { %v2026_v58 = vsel %vm2025_vm10, %v2024_v43, %v2018_v56 }
 0x6b2   : > { %v2022_v52 = vpop.permute.xlu0 %2021 }
 0x6b3   : > { %v2028_v57 = vsel %vm2027_vm11, %v2026_v58, %v2022_v52 }
 0x6b4   : > { %2661 = vmatmul.mubr.msk.f32.vlgmr.msra.gmra.mxu0 %vm623_vm0, %v2028_v57 }
 0x6b5   : > { %2690 = vmatprep.mubr.msk.f32.mxu0 %vm3035_vm1, %v3034_v8  ;;  %2675 = vmatpush3.msra.mxu0 %v2243_v26 }
 0x6b6   : > { %2676 = vmatprep.subr.mxu0 %v3034_v8 }
 0x6b7   : > { %2677 = vmatpush3.msra.mxu0 %v2242_v16 }
 0x6b8   : > { %2678 = vmatprep.subr.mxu0 %v3034_v8 }
 0x6b9   : > { %2679 = vmatpush3.msra.mxu0 %v2241_v17 }
 0x6ba   : > { %2680 = vmatprep.subr.mxu0 %v3034_v8 }
 0x6bb   : > { %2681 = vmatpush3.msra.mxu0 %v2240_v9 }
 0x6bc   : > { %2682 = vmatprep.subr.mxu0 %v3034_v8 }
 0x6bd   : > { %2683 = vmatpush3.msra.mxu0 %v2239_v27 }
 0x6be   : > { %2684 = vmatprep.subr.mxu0 %v3034_v8 }
 0x6bf   : > { %2685 = vmatpush3.msra.mxu0 %v2238_v28 }
 0x6c0   : > { %2686 = vmatprep.subr.mxu0 %v3034_v8 }
 0x6c1   : > { %2687 = vmatpush3.msra.mxu0 %v2237_v30 }
 0x6c2   : > { %2688 = vmatprep.subr.mxu0 %v3034_v8 }
 0x6c3   : > { %2689 = vmatpush3.msra.mxu0 %v2236_v31 }
 0x774   : > { %v2109_v60 = vpop.f32.mrf.mxu0 }
 0x775   : > { %v2110_v13 = vadd.f32 %v2544_v59, %v2109_v60 }
 0x776   : > { %v2662_v6 = vpop.f32.mrf.mxu0 }
 0x777   : > { %v3679_v62 = vadd.f32 %v2817_v61, %v2110_v13 }
 0x779   : > { %v2116_v63 = vsel %vm623_vm0, %v3679_v62, 0.0 }
 0x77a   : > { %2117 = vadd.xlane.f32.xlu1 %v2116_v63 }
 0x803   : > { %v2118_v0 = vpop.xlane.xlu1 %2117 }
 0x804   : > { %v2119_v1 = vmul.f32 0.03125, %v2118_v0 }
 0x806   : > { %v2120_v32 = vsub.f32 %v3679_v62, %v2119_v1 }
 0x808   : > { %v2121_v2 = vmul.f32 %v2120_v32, %v2120_v32 }
 0x80a   : > { %v2122_v3 = vsel %vm623_vm0, %v2121_v2, 0.0 }
 0x80b   : > { %2123 = vadd.xlane.f32.xlu0 %v2122_v3 }
 0x894   : > { %v2124_v20 = vpop.xlane.xlu0 %2123 }
 0x895   : > { %v2125_v21 = vmul.f32 0.03125, %v2124_v20 }
 0x897   : > { %v2126_v10 = vadd.f32 1e-12, %v2125_v21 }
 0x899   : > { %2813 = vrsqrt.f32 %v2126_v10 }
 0x8a6   : > { %v2814_v22 = vpop.eup %2813 }
 0x8a7   : > { %v2128_v4 = vmul.f32 %v2814_v22, %v2120_v32 }
 0x8a9   : > { %v2135_v45 = vmul.f32 %v2546_v18, %v2128_v4 }
 0x8ab   : > { %v2142_v25 = vadd.f32 %v2547_v24, %v2135_v45 }
 0x8ad   : > { %2672 = vmatmul.mubr.msk.f32.vlgmr.msra.gmra.mxu1 %vm623_vm0, %v2142_v25 }
 0x96d   : > { %v2223_v35 = vpop.f32.mrf.mxu1 }
 0x96e   : > { %v2224_v48 = vadd.f32 %v2548_v41, %v2223_v35 }
 0x96f   : > { %v2673_v19 = vpop.f32.mrf.mxu1 }
 0x970   : > { %v2228_v36 = vmul.f32 0.044715, %v2224_v48  ;;  %v2227_v8 = vmul.f32 0.5, %v2224_v48 }
 0x972   : > { %v2229_v11 = vmul.f32 %v2228_v36, %v2224_v48 }
 0x974   : > { %v2230_v38 = vmul.f32 %v2229_v11, %v2224_v48 }
 0x976   : > { %v2231_v39 = vadd.f32 %v2230_v38, %v2224_v48 }
 0x978   : > { %v2232_v40 = vmul.f32 0.7978846, %v2231_v39 }
 0x97a   : > { %2815 = vtanh.f32 %v2232_v40 }
 0x987   : > { %v2816_v42 = vpop.eup %2815 }
 0x988   : > { %v2234_v44 = vadd.f32 1.0, %v2816_v42 }
 0x98a   : > { %v2235_v46 = vmul.f32 %v2234_v44, %v2227_v8 }
 0x98c   : > { %2691 = vmatmul.mubr.msk.f32.vlgmr.msra.gmra.mxu0 %vm2251_vm12, %v2235_v46 }
 0x98d   : > { %2937 = shalt.err (!%p2934_p13)
}
 0x98e   : > { %s2938_s21 = scalar_lea.hbm %s3734_s27, 512  ;;  %s2942_s26 = scalar_lea.hbm %s3820_s16, 1024 }
 0x98f   : > { %p2939_p8 = scmp.ne.s32.totalorder %s3734_s27, %s2938_s21  ;;  %p2943_p1 = scmp.lt.s32.totalorder %s3734_s27, %s3820_s16 }
 0x990   : > { %p2944_p2 = scmp.lt.s32.totalorder %s2942_s26, %s2938_s21 }
 0x991   : > { %p2940_p10 = pnand %p2939_p8, %p3863_p12 }
 0x992   : > { %p2945_p4 = por %p2944_p2, %p2943_p1 }
 0x993   : > { %p2941_p11 = pneg %p2940_p10 }
 0x995   : > { %p2946_p6 = pnand %p2945_p4, %p2941_p11 }
 0x997   : > { %2949 = shalt.err (!%p2946_p6)
}
 0x998   : > { %s3052_s17 = smov 128   ;;  %s3864_s7 = sld [smem:[#allocation28_spill]] }
 0x999   : > { %2708 = dma.vmem_to_hbm [thread:$0]  (%p3863_p12), %s3736_s11, 512, %s3734_s27, %s2333_s29, %s3052_s17, %s3052_s17, %s3036_s18  }
 0x99a   : > { %s2554_s21 = sshll.u32 %s3160_s25, 7  ;;  %s599_s14 = scalar_lea.vmem [#allocation10], %s2514_s20 }
 0x99b   : > { %s2346_s2 = sshll.u32 %s599_s14, 4  ;;  %s3865_s19 = sld [smem:[#allocation29_spill]]  ;;  %s2347_s2 = int_to_ptr.vmem [resolvable:$true] %s2346_s2 }
 0x99c   : > { %s2328_s18 = scalar_lea.sflag [#allocation4], %s3265_s23  ;;  %s2950_s11 = scalar_lea.vmem %s2347_s2, 128 }
 0x99d   : > { %p2951_p0 = scmp.ne.s32.totalorder %s2347_s2, %s2950_s11  ;;  %s3053_s25 = smov [#allocation10]  }
 0x99e   : > { %v2550_v47 = vld [vmem:[%s3864_s7] ss:$0 sm:$0xff]  ;;  %s2954_s20 = sshll.u32 %s3053_s25, 4  ;;  %s2955_s20 = int_to_ptr.vmem [resolvable:$false] %s2954_s20 }
 0x99f   : > { %p2952_p5 = pnand %p2951_p0, %p3863_p12  ;;  %s2956_s27 = scalar_lea.vmem %s2955_s20, 256 }
 0x9a0   : > { %p2957_p7 = scmp.lt.s32.totalorder %s2347_s2, %s2955_s20  ;;  %p2958_p9 = scmp.lt.s32.totalorder %s2956_s27, %s2950_s11 }
 0x9a1   : > { %s2344_s0 = scalar_lea.hbm %s3865_s19, %s2554_s21  ;;  %p2953_p3 = pneg %p2952_p5 }
 0x9a2   : > { %p2959_p13 = por %p2958_p9, %p2957_p7 }
 0x9a4   : > { %p2960_p8 = pnand %p2959_p13, %p2953_p3 }
 0xa4c   : > { %v2321_v49 = vpop.f32.mrf.mxu0 }
 0xa4d   : > { %v2322_v12 = vadd.f32 %v2550_v47, %v2321_v49 }
 0xa4e   : > { %v2692_v50 = vpop.f32.mrf.mxu0 }
 0xa4f   : > { %v2325_v33 = vadd.f32 %v2322_v12, %v3679_v62 }
 0xa51   : > { %2326 = vst.msk [vmem:[%s599_s14] sm:$0xff] %vm623_vm0, %v2325_v33 }
 0xa52   : > { %2963 = shalt.err (!%p2960_p8)
}
 0xa53   : > { %s2964_s29 = scalar_lea.hbm %s2344_s0, 128  ;;  %s2968_s15 = scalar_lea.hbm %s3865_s19, 256 }
 0xa54   : > { %p2965_p10 = scmp.ne.s32.totalorder %s2344_s0, %s2964_s29  ;;  %p2969_p2 = scmp.lt.s32.totalorder %s2344_s0, %s3865_s19 }
 0xa55   : > { %p2970_p4 = scmp.lt.s32.totalorder %s2968_s15, %s2964_s29 }
 0xa56   : > { %p2966_p11 = pnand %p2965_p10, %p3863_p12 }
 0xa57   : > { %p2971_p6 = por %p2970_p4, %p2969_p2 }
 0xa58   : > { %p2967_p1 = pneg %p2966_p11 }
 0xa5a   : > { %p2972_p0 = pnand %p2971_p6, %p2967_p1 }
 0xa5c   : > { %2975 = shalt.err (!%p2972_p0)
}
 0xa5d   : > { %2707 = dma.vmem_to_hbm [thread:$0]  (%p3863_p12), %s2347_s2, 128, %s2344_s0, %s2328_s18  }
 0xa5e PF: > { %s3866_s21 = sld [smem:[#allocation18_spill]] }
 0xa5f   : > { %s3867_s14 = sld [smem:[#allocation21_spill]] }
 0xa60   : > { %s3868_s26 = sld [smem:[#allocation20_spill]] }
 0xa64   : > { %s2374_s24 = sand.u32 1, %s3866_s21  }
 0xa65   : > { %p3869_p5 = scmp.ne.s32.totalorder %s3867_s14, 0  ;;  %s2375_s11 = scalar_lea.sflag [#allocation4], %s2374_s24 }
 0xa66   : > { %p3870_p3 = scmp.ge.s32.totalorder %s3868_s26, 2 }
 0xa68   : > { %p2726_p7 = pnand %p3870_p3, %p3869_p5 }
 0xa6a   : > { %p2727_p9 = pneg %p2726_p7 }
 0xa6c   : > { %3005 = dma.done.wait (%p2727_p9), %s2375_s11, 128  }
 0xa6d   : > { %3007 = vsyncadd (%p2727_p9), %s2375_s11, 4294967168  ;;  %s2384_s25 = scalar_lea.sflag [#allocation12], %s2374_s24 }
 0xa6e   : > { %3009 = dma.done.wait (%p2727_p9), %s2384_s25, 512  }
 0xa6f   : > { %3011 = vsyncadd (%p2727_p9), %s2384_s25, 4294966784  ;;  %s3871_s24 = sld [smem:[#allocation22_spill]]  ;;  %s3874_s21 = smov %s3018_s22 }
 0xa70   : > { %s3872_s20 = sld [smem:[#allocation19_spill]] }
 0xa71   : > { %s3873_s23 = sld [smem:[#allocation23_spill]] }
 0xa75   : > { %p35_p12 = scmp.ge.s32.totalorder %s3871_s24, 4  }
 0xa76   : > { %s3875_s22 = smov %s3872_s20 }
 0xa77   :  { %37 = sbr.rel (!%p35_p12) target bundleno = 16 (0x10), region = 163 }
 0xa7c   :  { %2389 = vsyncpa [#allocation3], 1 }
 0xa7d   :  { %2391 = vsyncpa [#allocation3 + $0x1], 1 }
 0xa7e   :  { %2392 = vsyncpa [#allocation6], 1 }
 0xa7f   :  { %2393 = vsyncpa [#allocation9], 1 }
 0xa80   :  { %2394 = vsyncpa [#allocation4], 1 }
 0xa81   :  { %2396 = vsyncpa [#allocation4 + $0x1], 1 }
 0xa82   :  { %2397 = vsyncpa [#allocation12], 1 }
 0xa83   :  { %2399 = vsyncpa [#allocation12 + $0x1], 1 }

</bundles_post_ra>
